<compile_context>
chip_gen: v7x
topology: tpu7x:2x2x1
jax: 0.10.0
libtpu: 0.0.40
codegen_flags: <defaults>
</compile_context>

<pallas_src>
import math

import jax
import jax.numpy as jnp
from jax.experimental import pallas as pl
from jax.experimental.pallas import tpu as pltpu

# ---- model hyper-parameters (module-level globals in the PyTorch code) ----
d_model = 32
d_k = 16
d_v = 16
n_heads = 4
d_ff = 128   # d_ff is an (undefined) global in the spec; small, lane-aligned


def _qk_t(q, k):
    """q @ k.T via dot_general (contract last dims; no explicit transpose)."""
    return jax.lax.dot_general(
        q, k, dimension_numbers=(((1,), (1,)), ((), ())),
        preferred_element_type=jnp.float32)


def _encoder_layer_kernel(act_ref, bg_ref,
                          w_sa_qkv_ref, w_sa_fc_ref,
                          w1_ab_ref, w2_a_ref, w2_b_ref,
                          w_abi_ref, fca_ref, fcb_ref,
                          w1_aabb_ref, w2_aa_ref, w2_bb_ref,
                          oa_ref, ob_ref, attn_ref):
    f32 = jnp.float32
    Bt, L, D = act_ref.shape
    n = Bt * L
    Hk = n_heads * d_k                       # 64
    scale = f32(1.0 / math.sqrt(d_k))

    def layer_norm(x):
        mu = jnp.mean(x, axis=-1, keepdims=True)
        var = jnp.mean(jnp.square(x - mu), axis=-1, keepdims=True)
        return (x - mu) * jax.lax.rsqrt(var + f32(1e-5))

    def softmax_rows(s):
        m = jnp.max(s, axis=-1, keepdims=True)
        e = jnp.exp(s - m)
        return e * pl.reciprocal(jnp.sum(e, axis=-1, keepdims=True), approx=True)

    # ---- load inputs / weights once --------------------------------------
    a = act_ref[...].reshape(n, D).astype(f32)          # action_feat (residual)
    b = bg_ref[...].reshape(n, D).astype(f32)           # background_feat
    w_sa_qkv = w_sa_qkv_ref[...]                        # (D, 3*Hk)  [Wq|Wk|Wv]
    w_sa_fc = w_sa_fc_ref[...]                          # (Hk, D)
    w1_ab = w1_ab_ref[...]                              # (D, 2*d_ff) [W1a|W1b]
    w2_a = w2_a_ref[...]                                # (d_ff, D)
    w2_b = w2_b_ref[...]
    w_abi = w_abi_ref[...]                              # (D, 4*Hk) [Wq|Wk|Wva|Wvb]
    fca = fca_ref[...]                                  # (Hk, D)
    fcb = fcb_ref[...]
    w1_aabb = w1_aabb_ref[...]                          # (D, 2*d_ff)
    w2_aa = w2_aa_ref[...]
    w2_bb = w2_bb_ref[...]

    # ==== stage 1: shared-weight self-attention on both streams ===========
    x0 = jnp.concatenate([a, b], axis=0)                          # (2n, D)
    qkv = jnp.dot(x0, w_sa_qkv, preferred_element_type=f32)       # (2n, 3*Hk)

    def self_attention(row0, resid):
        # row0: 0 -> action rows, n -> background rows (static Python ints).
        Q = qkv[row0:row0 + n, 0:Hk]
        K = qkv[row0:row0 + n, Hk:2 * Hk]
        V = qkv[row0:row0 + n, 2 * Hk:3 * Hk]
        blocks = []
        for bi in range(Bt):
            r0 = bi * L
            # all heads' scores stacked on sublanes -> one softmax pass
            scores = jnp.concatenate(
                [_qk_t(Q[r0:r0 + L, h * d_k:(h + 1) * d_k],
                       K[r0:r0 + L, h * d_k:(h + 1) * d_k]) * scale
                 for h in range(n_heads)], axis=0)                 # (H*L, L)
            p_all = softmax_rows(scores)
            acc = jnp.zeros((L, D), f32)
            for h in range(n_heads):
                p = p_all[h * L:(h + 1) * L, :]
                ctx = jnp.dot(p, V[r0:r0 + L, h * d_v:(h + 1) * d_v],
                              preferred_element_type=f32)          # (L, d_v)
                acc = acc + jnp.dot(ctx, w_sa_fc[h * d_v:(h + 1) * d_v, :],
                                    preferred_element_type=f32)
            blocks.append(acc)
        out = blocks[0] if Bt == 1 else jnp.concatenate(blocks, axis=0)
        return layer_norm(out + resid)

    y1a = self_attention(0, a)       # enc_self_attn(action, action, action)
    y1b = self_attention(n, b)       # enc_self_attn(background, ... )

    # ==== stage 2: pos_ffn_a / pos_ffn_b ===================================
    y1 = jnp.concatenate([y1a, y1b], axis=0)                       # (2n, D)
    h1 = jnp.maximum(jnp.dot(y1, w1_ab, preferred_element_type=f32), f32(0.0))
    fa = jnp.dot(h1[0:n, 0:d_ff], w2_a, preferred_element_type=f32)
    fb = jnp.dot(h1[n:2 * n, d_ff:2 * d_ff], w2_b, preferred_element_type=f32)
    aq = layer_norm(fa + y1a)        # action_query (also action_value)
    kv = layer_norm(fb + y1b)        # key_value_bg

    # ==== stage 3: ABI multi-head attention ================================
    y2 = jnp.concatenate([aq, kv], axis=0)                          # (2n, D)
    proj = jnp.dot(y2, w_abi, preferred_element_type=f32)           # (2n, 4*Hk)
    Q = proj[0:n, 0:Hk]                  # from q_action      (= aq)
    K = proj[n:2 * n, Hk:2 * Hk]         # from k_background  (= kv)
    VA = proj[0:n, 2 * Hk:3 * Hk]        # from v_action      (= aq)
    VB = proj[n:2 * n, 3 * Hk:4 * Hk]    # from v_background  (= kv)

    oa_blocks, ob_blocks, attn_blocks = [], [], []
    for bi in range(Bt):
        r0 = bi * L
        scores = jnp.concatenate(
            [_qk_t(Q[r0:r0 + L, h * d_k:(h + 1) * d_k],
                   K[r0:r0 + L, h * d_k:(h + 1) * d_k]) * scale
             for h in range(n_heads)], axis=0)                      # (H*L, L)
        p_all = softmax_rows(scores)
        acc_a = jnp.zeros((L, D), f32)
        acc_b = jnp.zeros((L, D), f32)
        p_heads = []
        for h in range(n_heads):
            p = p_all[h * L:(h + 1) * L, :]
            p_heads.append(p)
            cva = jnp.dot(p, VA[r0:r0 + L, h * d_v:(h + 1) * d_v],
                          preferred_element_type=f32)
            cvb = jnp.dot(p, VB[r0:r0 + L, h * d_v:(h + 1) * d_v],
                          preferred_element_type=f32)
            acc_a = acc_a + jnp.dot(cva, fca[h * d_v:(h + 1) * d_v, :],
                                    preferred_element_type=f32)
            acc_b = acc_b + jnp.dot(cvb, fcb[h * d_v:(h + 1) * d_v, :],
                                    preferred_element_type=f32)
        oa_blocks.append(layer_norm(acc_a + aq[r0:r0 + L, :]))
        ob_blocks.append(layer_norm(acc_b + kv[r0:r0 + L, :]))
        # lane-dense staging of attention weights: (L, H*L)
        attn_blocks.append(jnp.concatenate(p_heads, axis=-1))

    o3a = oa_blocks[0] if Bt == 1 else jnp.concatenate(oa_blocks, axis=0)
    o3b = ob_blocks[0] if Bt == 1 else jnp.concatenate(ob_blocks, axis=0)

    # one wide (lane-dense) store for the attention probabilities
    attn_ref[...] = jnp.stack(attn_blocks, axis=0).astype(attn_ref.dtype)

    # ==== stage 4: pos_ffn_aa / pos_ffn_bb =================================
    y3 = jnp.concatenate([o3a, o3b], axis=0)                        # (2n, D)
    h2 = jnp.maximum(jnp.dot(y3, w1_aabb, preferred_element_type=f32), f32(0.0))
    fa2 = jnp.dot(h2[0:n, 0:d_ff], w2_aa, preferred_element_type=f32)
    fb2 = jnp.dot(h2[n:2 * n, d_ff:2 * d_ff], w2_bb, preferred_element_type=f32)
    out_a = layer_norm(fa2 + o3a)
    out_b = layer_norm(fb2 + o3b)

    oa_ref[...] = out_a.reshape(Bt, L, D).astype(oa_ref.dtype)
    ob_ref[...] = out_b.reshape(Bt, L, D).astype(ob_ref.dtype)


@jax.jit
def encoder_layer(action_feat, background_feat, params):
    """action_feat / background_feat: (B, L, d_model) float32."""
    B, L, D = action_feat.shape
    assert D == d_model and background_feat.shape == (B, L, D)

    # Two grid steps when possible (keeps both v7x TensorCores busy); the rest
    # of the batch is folded onto the sublane axis inside each block, which
    # removes per-step pipeline overhead on single-TC chips (v5e/v6e).
    G = 2 if (B >= 2 and B % 2 == 0) else 1
    Bt = B // G

    # Trace-time weight fusion (free at run time): one wide MXU matmul inside
    # the kernel instead of 3-4 skinny ones.
    w_sa_qkv = jnp.concatenate(
        [params["sa_wq"], params["sa_wk"], params["sa_wv"]], axis=1)
    w1_ab = jnp.concatenate([params["ffn_a_w1"], params["ffn_b_w1"]], axis=1)
    w_abi = jnp.concatenate(
        [params["abi_wq"], params["abi_wk"],
         params["abi_wva"], params["abi_wvb"]], axis=1)
    w1_aabb = jnp.concatenate([params["ffn_aa_w1"], params["ffn_bb_w1"]], axis=1)

    seq_spec = pl.BlockSpec((Bt, L, D), lambda g: (g, 0, 0))
    attn_spec = pl.BlockSpec((Bt, L, n_heads * L), lambda g: (g, 0, 0))

    def full2d(r, c):
        return pl.BlockSpec((r, c), lambda g: (0, 0))

    out_a, out_b, attn_flat = pl.pallas_call(
        _encoder_layer_kernel,
        out_shape=(
            jax.ShapeDtypeStruct((B, L, d_model), jnp.float32),
            jax.ShapeDtypeStruct((B, L, d_model), jnp.float32),
            jax.ShapeDtypeStruct((B, L, n_heads * L), jnp.float32),
        ),
        grid_spec=pltpu.PrefetchScalarGridSpec(
            num_scalar_prefetch=0,
            grid=(G,),
            in_specs=[
                seq_spec, seq_spec,
                full2d(d_model, 3 * n_heads * d_k),   # fused self-attn QKV
                full2d(n_heads * d_v, d_model),       # self-attn fc
                full2d(d_model, 2 * d_ff),            # fused ffn_a|ffn_b  W1
                full2d(d_ff, d_model),                # ffn_a  W2
                full2d(d_ff, d_model),                # ffn_b  W2
                full2d(d_model, 4 * n_heads * d_k),   # fused ABI projections
                full2d(n_heads * d_v, d_model),       # ABI fc_a
                full2d(n_heads * d_v, d_model),       # ABI fc_b
                full2d(d_model, 2 * d_ff),            # fused ffn_aa|ffn_bb W1
                full2d(d_ff, d_model),                # ffn_aa W2
                full2d(d_ff, d_model),                # ffn_bb W2
            ],
            out_specs=[seq_spec, seq_spec, attn_spec],
        ),
        compiler_params=pltpu.CompilerParams(
            dimension_semantics=("parallel",)),
    )(action_feat, background_feat,
      w_sa_qkv, params["sa_fc"],
      w1_ab, params["ffn_a_w2"], params["ffn_b_w2"],
      w_abi, params["abi_fca"], params["abi_fcb"],
      w1_aabb, params["ffn_aa_w2"], params["ffn_bb_w2"])

    # (B, L, H*L) -> (B, H, L, L); pure layout op, handled by XLA outside.
    attn = attn_flat.reshape(B, L, n_heads, L).transpose(0, 2, 1, 3)
    return out_a, out_b, attn


# ---------------------------- plain-JAX reference ---------------------------
def _reference(action, background, p):
    def ln(x):
        mu = x.mean(-1, keepdims=True)
        var = ((x - mu) ** 2).mean(-1, keepdims=True)
        return (x - mu) / jnp.sqrt(var + 1e-5)

    def split(x, w, dh):
        B, L, _ = x.shape
        return (x @ w).reshape(B, L, n_heads, dh).transpose(0, 2, 1, 3)

    def mha(q_in, k_in, v_in):
        B, L, _ = q_in.shape
        Q = split(q_in, p["sa_wq"], d_k)
        K = split(k_in, p["sa_wk"], d_k)
        V = split(v_in, p["sa_wv"], d_v)
        scores = jnp.einsum("bhqd,bhkd->bhqk", Q, K) / math.sqrt(d_k)
        attn = jax.nn.softmax(scores, axis=-1)
        ctx = jnp.einsum("bhqk,bhkd->bhqd", attn, V)
        ctx = ctx.transpose(0, 2, 1, 3).reshape(B, L, n_heads * d_v)
        return ln(ctx @ p["sa_fc"] + q_in)

    def abi_mha(q_in, k_in, va_in, vb_in):
        B, L, _ = q_in.shape
        Q = split(q_in, p["abi_wq"], d_k)
        K = split(k_in, p["abi_wk"], d_k)
        VA = split(va_in, p["abi_wva"], d_v)
        VB = split(vb_in, p["abi_wvb"], d_v)
        scores = jnp.einsum("bhqd,bhkd->bhqk", Q, K) / math.sqrt(d_k)
        attn = jax.nn.softmax(scores, axis=-1)
        ca = jnp.einsum("bhqk,bhkd->bhqd", attn, VA)
        cb = jnp.einsum("bhqk,bhkd->bhqd", attn, VB)
        ca = ca.transpose(0, 2, 1, 3).reshape(B, L, n_heads * d_v)
        cb = cb.transpose(0, 2, 1, 3).reshape(B, L, n_heads * d_v)
        oa = ln(ca @ p["abi_fca"] + q_in)
        ob = ln(cb @ p["abi_fcb"] + k_in)
        return oa, ob, attn

    def ffn(x, w1, w2):
        return ln(jnp.maximum(x @ w1, 0.0) @ w2 + x)

    aq = mha(action, action, action)
    kv = mha(background, background, background)
    aq = ffn(aq, p["ffn_a_w1"], p["ffn_a_w2"])
    kv = ffn(kv, p["ffn_b_w1"], p["ffn_b_w2"])
    oa, ob, attn = abi_mha(aq, kv, aq, kv)
    oa = ffn(oa, p["ffn_aa_w1"], p["ffn_aa_w2"])
    ob = ffn(ob, p["ffn_bb_w1"], p["ffn_bb_w2"])
    return oa, ob, attn


def init_params(key):
    """Deterministic init. Weights stored as [in_features, out_features]."""
    ks = jax.random.split(key, 18)

    def lin(k, fan_in, fan_out):
        bound = 1.0 / math.sqrt(fan_in)
        return jax.random.uniform(k, (fan_in, fan_out), jnp.float32, -bound, bound)

    it = iter(ks)
    return {
        "sa_wq": lin(next(it), d_model, n_heads * d_k),
        "sa_wk": lin(next(it), d_model, n_heads * d_k),
        "sa_wv": lin(next(it), d_model, n_heads * d_v),
        "sa_fc": lin(next(it), n_heads * d_v, d_model),
        "ffn_a_w1": lin(next(it), d_model, d_ff),
        "ffn_a_w2": lin(next(it), d_ff, d_model),
        "ffn_b_w1": lin(next(it), d_model, d_ff),
        "ffn_b_w2": lin(next(it), d_ff, d_model),
        "abi_wq": lin(next(it), d_model, n_heads * d_k),
        "abi_wk": lin(next(it), d_model, n_heads * d_k),
        "abi_wva": lin(next(it), d_model, n_heads * d_v),
        "abi_wvb": lin(next(it), d_model, n_heads * d_v),
        "abi_fca": lin(next(it), n_heads * d_v, d_model),
        "abi_fcb": lin(next(it), n_heads * d_v, d_model),
        "ffn_aa_w1": lin(next(it), d_model, d_ff),
        "ffn_aa_w2": lin(next(it), d_ff, d_model),
        "ffn_bb_w1": lin(next(it), d_model, d_ff),
        "ffn_bb_w2": lin(next(it), d_ff, d_model),
    }


if __name__ == "__main__":
    key = jax.random.PRNGKey(0)
    k_params, k_a, k_b = jax.random.split(key, 3)

    B, L = 2, 8
    params = init_params(k_params)
    action_feat = jax.random.normal(k_a, (B, L, d_model), jnp.float32)
    background_feat = jax.random.normal(k_b, (B, L, d_model), jnp.float32)

    out_a, out_b, attn = encoder_layer(action_feat, background_feat, params)
    jax.block_until_ready((out_a, out_b, attn))

    # sanity check against plain-JAX reference (loose tol: approx reciprocal
    # is used for the softmax denominator inside the kernel).
    ra, rb, rattn = _reference(action_feat, background_feat, params)
    assert out_a.shape == (B, L, d_model)
    assert out_b.shape == (B, L, d_model)
    assert attn.shape == (B, n_heads, L, L)
    assert jnp.allclose(out_a, ra, atol=1e-2, rtol=1e-2)
    assert jnp.allclose(out_b, rb, atol=1e-2, rtol=1e-2)
    assert jnp.allclose(attn, rattn, atol=1e-2, rtol=1e-2)

    print("KERNEL_OK")
</pallas_src>

<mosaic_0001>
module attributes {stable_mosaic.version = 11 : i64} {
  func.func @_encoder_layer_kernel(%arg0: i32, %arg1: memref<1x8x32xf32, #tpu.memory_space<vmem>>, %arg2: memref<1x8x32xf32, #tpu.memory_space<vmem>>, %arg3: memref<32x192xf32, #tpu.memory_space<vmem>>, %arg4: memref<64x32xf32, #tpu.memory_space<vmem>>, %arg5: memref<32x256xf32, #tpu.memory_space<vmem>>, %arg6: memref<128x32xf32, #tpu.memory_space<vmem>>, %arg7: memref<128x32xf32, #tpu.memory_space<vmem>>, %arg8: memref<32x256xf32, #tpu.memory_space<vmem>>, %arg9: memref<64x32xf32, #tpu.memory_space<vmem>>, %arg10: memref<64x32xf32, #tpu.memory_space<vmem>>, %arg11: memref<32x256xf32, #tpu.memory_space<vmem>>, %arg12: memref<128x32xf32, #tpu.memory_space<vmem>>, %arg13: memref<128x32xf32, #tpu.memory_space<vmem>>, %arg14: memref<1x8x32xf32, #tpu.memory_space<vmem>>, %arg15: memref<1x8x32xf32, #tpu.memory_space<vmem>>, %arg16: memref<1x8x32xf32, #tpu.memory_space<vmem>>) attributes {dimension_semantics = [#tpu.dimension_semantics<parallel>], iteration_bounds = array<i64: 2>, scalar_prefetch = 0 : i64, scratch_operands = 0 : i64, tpu.core_type = #tpu.core_type<tc>, window_params = [{transform_indices = @transform_0, window_bounds = array<i64: 1, 8, 32>}, {transform_indices = @transform_1, window_bounds = array<i64: 1, 8, 32>}, {pipeline_mode = #tpu.pipeline_mode<synchronous>, transform_indices = @transform_2, window_bounds = array<i64: 32, 192>}, {pipeline_mode = #tpu.pipeline_mode<synchronous>, transform_indices = @transform_3, window_bounds = array<i64: 64, 32>}, {pipeline_mode = #tpu.pipeline_mode<synchronous>, transform_indices = @transform_4, window_bounds = array<i64: 32, 256>}, {pipeline_mode = #tpu.pipeline_mode<synchronous>, transform_indices = @transform_5, window_bounds = array<i64: 128, 32>}, {pipeline_mode = #tpu.pipeline_mode<synchronous>, transform_indices = @transform_6, window_bounds = array<i64: 128, 32>}, {pipeline_mode = #tpu.pipeline_mode<synchronous>, transform_indices = @transform_7, window_bounds = array<i64: 32, 256>}, {pipeline_mode = #tpu.pipeline_mode<synchronous>, transform_indices = @transform_8, window_bounds = array<i64: 64, 32>}, {pipeline_mode = #tpu.pipeline_mode<synchronous>, transform_indices = @transform_9, window_bounds = array<i64: 64, 32>}, {pipeline_mode = #tpu.pipeline_mode<synchronous>, transform_indices = @transform_10, window_bounds = array<i64: 32, 256>}, {pipeline_mode = #tpu.pipeline_mode<synchronous>, transform_indices = @transform_11, window_bounds = array<i64: 128, 32>}, {pipeline_mode = #tpu.pipeline_mode<synchronous>, transform_indices = @transform_12, window_bounds = array<i64: 128, 32>}, {transform_indices = @transform_13, window_bounds = array<i64: 1, 8, 32>}, {transform_indices = @transform_14, window_bounds = array<i64: 1, 8, 32>}, {transform_indices = @transform_15, window_bounds = array<i64: 1, 8, 32>}]} {
    %c0 = arith.constant 0 : index
    %c0_0 = arith.constant 0 : index
    %c0_1 = arith.constant 0 : index
    %0 = vector.load %arg1[%c0, %c0_0, %c0_1] : memref<1x8x32xf32, #tpu.memory_space<vmem>>, vector<1x8x32xf32>
    %1 = vector.shape_cast %0 : vector<1x8x32xf32> to vector<8x32xf32>
    %c0_2 = arith.constant 0 : index
    %c0_3 = arith.constant 0 : index
    %c0_4 = arith.constant 0 : index
    %2 = vector.load %arg2[%c0_2, %c0_3, %c0_4] : memref<1x8x32xf32, #tpu.memory_space<vmem>>, vector<1x8x32xf32>
    %3 = vector.shape_cast %2 : vector<1x8x32xf32> to vector<8x32xf32>
    %c0_5 = arith.constant 0 : index
    %c0_6 = arith.constant 0 : index
    %4 = vector.load %arg3[%c0_5, %c0_6] : memref<32x192xf32, #tpu.memory_space<vmem>>, vector<32x192xf32>
    %c0_7 = arith.constant 0 : index
    %c0_8 = arith.constant 0 : index
    %5 = vector.load %arg4[%c0_7, %c0_8] : memref<64x32xf32, #tpu.memory_space<vmem>>, vector<64x32xf32>
    %c0_9 = arith.constant 0 : index
    %c0_10 = arith.constant 0 : index
    %6 = vector.load %arg5[%c0_9, %c0_10] : memref<32x256xf32, #tpu.memory_space<vmem>>, vector<32x256xf32>
    %c0_11 = arith.constant 0 : index
    %c0_12 = arith.constant 0 : index
    %7 = vector.load %arg6[%c0_11, %c0_12] : memref<128x32xf32, #tpu.memory_space<vmem>>, vector<128x32xf32>
    %c0_13 = arith.constant 0 : index
    %c0_14 = arith.constant 0 : index
    %8 = vector.load %arg7[%c0_13, %c0_14] : memref<128x32xf32, #tpu.memory_space<vmem>>, vector<128x32xf32>
    %c0_15 = arith.constant 0 : index
    %c0_16 = arith.constant 0 : index
    %9 = vector.load %arg8[%c0_15, %c0_16] : memref<32x256xf32, #tpu.memory_space<vmem>>, vector<32x256xf32>
    %c0_17 = arith.constant 0 : index
    %c0_18 = arith.constant 0 : index
    %10 = vector.load %arg9[%c0_17, %c0_18] : memref<64x32xf32, #tpu.memory_space<vmem>>, vector<64x32xf32>
    %c0_19 = arith.constant 0 : index
    %c0_20 = arith.constant 0 : index
    %11 = vector.load %arg10[%c0_19, %c0_20] : memref<64x32xf32, #tpu.memory_space<vmem>>, vector<64x32xf32>
    %c0_21 = arith.constant 0 : index
    %c0_22 = arith.constant 0 : index
    %12 = vector.load %arg11[%c0_21, %c0_22] : memref<32x256xf32, #tpu.memory_space<vmem>>, vector<32x256xf32>
    %c0_23 = arith.constant 0 : index
    %c0_24 = arith.constant 0 : index
    %13 = vector.load %arg12[%c0_23, %c0_24] : memref<128x32xf32, #tpu.memory_space<vmem>>, vector<128x32xf32>
    %c0_25 = arith.constant 0 : index
    %c0_26 = arith.constant 0 : index
    %14 = vector.load %arg13[%c0_25, %c0_26] : memref<128x32xf32, #tpu.memory_space<vmem>>, vector<128x32xf32>
    %15 = tpu.concatenate %1, %3 in 0 : vector<8x32xf32>, vector<8x32xf32> -> vector<16x32xf32>
    %cst = arith.constant dense<0.000000e+00> : vector<16x192xf32>
    %16 = tpu.matmul %15, %4, %cst {dimension_numbers = #tpu.dot_dimension_numbers<[1], [0], [0], [1], [0, 0, 1, 1], [], []>} : vector<16x32xf32>, vector<32x192xf32>, vector<16x192xf32> -> vector<16x192xf32>
    %17 = vector.extract_strided_slice %16 {offsets = [0, 0], sizes = [8, 64], strides = [1, 1]} : vector<16x192xf32> to vector<8x64xf32>
    %18 = vector.extract_strided_slice %16 {offsets = [0, 64], sizes = [8, 64], strides = [1, 1]} : vector<16x192xf32> to vector<8x64xf32>
    %19 = vector.extract_strided_slice %16 {offsets = [0, 128], sizes = [8, 64], strides = [1, 1]} : vector<16x192xf32> to vector<8x64xf32>
    %20 = vector.extract_strided_slice %17 {offsets = [0, 0], sizes = [8, 16], strides = [1, 1]} : vector<8x64xf32> to vector<8x16xf32>
    %21 = vector.extract_strided_slice %18 {offsets = [0, 0], sizes = [8, 16], strides = [1, 1]} : vector<8x64xf32> to vector<8x16xf32>
    %cst_27 = arith.constant dense<0.000000e+00> : vector<8x8xf32>
    %22 = tpu.matmul %20, %21, %cst_27 {dimension_numbers = #tpu.dot_dimension_numbers<[1], [1], [0], [0], [0, 0, 1, 0], [], []>} : vector<8x16xf32>, vector<8x16xf32>, vector<8x8xf32> -> vector<8x8xf32>
    %cst_28 = arith.constant 2.500000e-01 : f32
    %23 = vector.broadcast %cst_28 : f32 to vector<8x8xf32>
    %24 = arith.mulf %22, %23 : vector<8x8xf32>
    %25 = vector.extract_strided_slice %17 {offsets = [0, 16], sizes = [8, 16], strides = [1, 1]} : vector<8x64xf32> to vector<8x16xf32>
    %26 = vector.extract_strided_slice %18 {offsets = [0, 16], sizes = [8, 16], strides = [1, 1]} : vector<8x64xf32> to vector<8x16xf32>
    %cst_29 = arith.constant dense<0.000000e+00> : vector<8x8xf32>
    %27 = tpu.matmul %25, %26, %cst_29 {dimension_numbers = #tpu.dot_dimension_numbers<[1], [1], [0], [0], [0, 0, 1, 0], [], []>} : vector<8x16xf32>, vector<8x16xf32>, vector<8x8xf32> -> vector<8x8xf32>
    %cst_30 = arith.constant 2.500000e-01 : f32
    %28 = vector.broadcast %cst_30 : f32 to vector<8x8xf32>
    %29 = arith.mulf %27, %28 : vector<8x8xf32>
    %30 = vector.extract_strided_slice %17 {offsets = [0, 32], sizes = [8, 16], strides = [1, 1]} : vector<8x64xf32> to vector<8x16xf32>
    %31 = vector.extract_strided_slice %18 {offsets = [0, 32], sizes = [8, 16], strides = [1, 1]} : vector<8x64xf32> to vector<8x16xf32>
    %cst_31 = arith.constant dense<0.000000e+00> : vector<8x8xf32>
    %32 = tpu.matmul %30, %31, %cst_31 {dimension_numbers = #tpu.dot_dimension_numbers<[1], [1], [0], [0], [0, 0, 1, 0], [], []>} : vector<8x16xf32>, vector<8x16xf32>, vector<8x8xf32> -> vector<8x8xf32>
    %cst_32 = arith.constant 2.500000e-01 : f32
    %33 = vector.broadcast %cst_32 : f32 to vector<8x8xf32>
    %34 = arith.mulf %32, %33 : vector<8x8xf32>
    %35 = vector.extract_strided_slice %17 {offsets = [0, 48], sizes = [8, 16], strides = [1, 1]} : vector<8x64xf32> to vector<8x16xf32>
    %36 = vector.extract_strided_slice %18 {offsets = [0, 48], sizes = [8, 16], strides = [1, 1]} : vector<8x64xf32> to vector<8x16xf32>
    %cst_33 = arith.constant dense<0.000000e+00> : vector<8x8xf32>
    %37 = tpu.matmul %35, %36, %cst_33 {dimension_numbers = #tpu.dot_dimension_numbers<[1], [1], [0], [0], [0, 0, 1, 0], [], []>} : vector<8x16xf32>, vector<8x16xf32>, vector<8x8xf32> -> vector<8x8xf32>
    %cst_34 = arith.constant 2.500000e-01 : f32
    %38 = vector.broadcast %cst_34 : f32 to vector<8x8xf32>
    %39 = arith.mulf %37, %38 : vector<8x8xf32>
    %40 = tpu.concatenate %24, %29, %34, %39 in 0 : vector<8x8xf32>, vector<8x8xf32>, vector<8x8xf32>, vector<8x8xf32> -> vector<32x8xf32>
    %cst_35 = arith.constant dense<0xFF800000> : vector<32xf32>
    %41 = vector.multi_reduction <maximumf>, %40, %cst_35 [1] : vector<32x8xf32> to vector<32xf32>
    %42 = vector.shape_cast %41 : vector<32xf32> to vector<32x1xf32>
    %43 = vector.broadcast %42 : vector<32x1xf32> to vector<32x8xf32>
    %44 = arith.subf %40, %43 : vector<32x8xf32>
    %45 = math.exp %44 : vector<32x8xf32>
    %cst_36 = arith.constant dense<0.000000e+00> : vector<32xf32>
    %46 = vector.multi_reduction <add>, %45, %cst_36 [1] : vector<32x8xf32> to vector<32xf32>
    %47 = vector.shape_cast %46 : vector<32xf32> to vector<32x1xf32>
    %48 = tpu.reciprocal %47 {approx = true} : vector<32x1xf32> -> vector<32x1xf32>
    %49 = vector.broadcast %48 : vector<32x1xf32> to vector<32x8xf32>
    %50 = arith.mulf %45, %49 : vector<32x8xf32>
    %cst_37 = arith.constant 0.000000e+00 : f32
    %51 = vector.broadcast %cst_37 : f32 to vector<8x32xf32>
    %52 = vector.extract_strided_slice %50 {offsets = [0, 0], sizes = [8, 8], strides = [1, 1]} : vector<32x8xf32> to vector<8x8xf32>
    %53 = vector.extract_strided_slice %19 {offsets = [0, 0], sizes = [8, 16], strides = [1, 1]} : vector<8x64xf32> to vector<8x16xf32>
    %cst_38 = arith.constant dense<0.000000e+00> : vector<8x16xf32>
    %54 = tpu.matmul %52, %53, %cst_38 {dimension_numbers = #tpu.dot_dimension_numbers<[1], [0], [0], [1], [0, 0, 1, 1], [], []>} : vector<8x8xf32>, vector<8x16xf32>, vector<8x16xf32> -> vector<8x16xf32>
    %55 = vector.extract_strided_slice %5 {offsets = [0, 0], sizes = [16, 32], strides = [1, 1]} : vector<64x32xf32> to vector<16x32xf32>
    %cst_39 = arith.constant dense<0.000000e+00> : vector<8x32xf32>
    %56 = tpu.matmul %54, %55, %cst_39 {dimension_numbers = #tpu.dot_dimension_numbers<[1], [0], [0], [1], [0, 0, 1, 1], [], []>} : vector<8x16xf32>, vector<16x32xf32>, vector<8x32xf32> -> vector<8x32xf32>
    %57 = arith.addf %51, %56 : vector<8x32xf32>
    %58 = vector.extract_strided_slice %50 {offsets = [8, 0], sizes = [8, 8], strides = [1, 1]} : vector<32x8xf32> to vector<8x8xf32>
    %59 = vector.extract_strided_slice %19 {offsets = [0, 16], sizes = [8, 16], strides = [1, 1]} : vector<8x64xf32> to vector<8x16xf32>
    %cst_40 = arith.constant dense<0.000000e+00> : vector<8x16xf32>
    %60 = tpu.matmul %58, %59, %cst_40 {dimension_numbers = #tpu.dot_dimension_numbers<[1], [0], [0], [1], [0, 0, 1, 1], [], []>} : vector<8x8xf32>, vector<8x16xf32>, vector<8x16xf32> -> vector<8x16xf32>
    %61 = vector.extract_strided_slice %5 {offsets = [16, 0], sizes = [16, 32], strides = [1, 1]} : vector<64x32xf32> to vector<16x32xf32>
    %cst_41 = arith.constant dense<0.000000e+00> : vector<8x32xf32>
    %62 = tpu.matmul %60, %61, %cst_41 {dimension_numbers = #tpu.dot_dimension_numbers<[1], [0], [0], [1], [0, 0, 1, 1], [], []>} : vector<8x16xf32>, vector<16x32xf32>, vector<8x32xf32> -> vector<8x32xf32>
    %63 = arith.addf %57, %62 : vector<8x32xf32>
    %64 = vector.extract_strided_slice %50 {offsets = [16, 0], sizes = [8, 8], strides = [1, 1]} : vector<32x8xf32> to vector<8x8xf32>
    %65 = vector.extract_strided_slice %19 {offsets = [0, 32], sizes = [8, 16], strides = [1, 1]} : vector<8x64xf32> to vector<8x16xf32>
    %cst_42 = arith.constant dense<0.000000e+00> : vector<8x16xf32>
    %66 = tpu.matmul %64, %65, %cst_42 {dimension_numbers = #tpu.dot_dimension_numbers<[1], [0], [0], [1], [0, 0, 1, 1], [], []>} : vector<8x8xf32>, vector<8x16xf32>, vector<8x16xf32> -> vector<8x16xf32>
    %67 = vector.extract_strided_slice %5 {offsets = [32, 0], sizes = [16, 32], strides = [1, 1]} : vector<64x32xf32> to vector<16x32xf32>
    %cst_43 = arith.constant dense<0.000000e+00> : vector<8x32xf32>
    %68 = tpu.matmul %66, %67, %cst_43 {dimension_numbers = #tpu.dot_dimension_numbers<[1], [0], [0], [1], [0, 0, 1, 1], [], []>} : vector<8x16xf32>, vector<16x32xf32>, vector<8x32xf32> -> vector<8x32xf32>
    %69 = arith.addf %63, %68 : vector<8x32xf32>
    %70 = vector.extract_strided_slice %50 {offsets = [24, 0], sizes = [8, 8], strides = [1, 1]} : vector<32x8xf32> to vector<8x8xf32>
    %71 = vector.extract_strided_slice %19 {offsets = [0, 48], sizes = [8, 16], strides = [1, 1]} : vector<8x64xf32> to vector<8x16xf32>
    %cst_44 = arith.constant dense<0.000000e+00> : vector<8x16xf32>
    %72 = tpu.matmul %70, %71, %cst_44 {dimension_numbers = #tpu.dot_dimension_numbers<[1], [0], [0], [1], [0, 0, 1, 1], [], []>} : vector<8x8xf32>, vector<8x16xf32>, vector<8x16xf32> -> vector<8x16xf32>
    %73 = vector.extract_strided_slice %5 {offsets = [48, 0], sizes = [16, 32], strides = [1, 1]} : vector<64x32xf32> to vector<16x32xf32>
    %cst_45 = arith.constant dense<0.000000e+00> : vector<8x32xf32>
    %74 = tpu.matmul %72, %73, %cst_45 {dimension_numbers = #tpu.dot_dimension_numbers<[1], [0], [0], [1], [0, 0, 1, 1], [], []>} : vector<8x16xf32>, vector<16x32xf32>, vector<8x32xf32> -> vector<8x32xf32>
    %75 = arith.addf %69, %74 : vector<8x32xf32>
    %76 = arith.addf %75, %1 : vector<8x32xf32>
    %cst_46 = arith.constant dense<0.000000e+00> : vector<8xf32>
    %77 = vector.multi_reduction <add>, %76, %cst_46 [1] : vector<8x32xf32> to vector<8xf32>
    %78 = vector.shape_cast %77 : vector<8xf32> to vector<8x1xf32>
    %cst_47 = arith.constant 3.200000e+01 : f32
    %79 = vector.broadcast %cst_47 : f32 to vector<8x1xf32>
    %80 = arith.divf %78, %79 : vector<8x1xf32>
    %81 = vector.broadcast %80 : vector<8x1xf32> to vector<8x32xf32>
    %82 = arith.subf %76, %81 : vector<8x32xf32>
    %83 = arith.mulf %82, %82 : vector<8x32xf32>
    %cst_48 = arith.constant dense<0.000000e+00> : vector<8xf32>
    %84 = vector.multi_reduction <add>, %83, %cst_48 [1] : vector<8x32xf32> to vector<8xf32>
    %85 = vector.shape_cast %84 : vector<8xf32> to vector<8x1xf32>
    %cst_49 = arith.constant 3.200000e+01 : f32
    %86 = vector.broadcast %cst_49 : f32 to vector<8x1xf32>
    %87 = arith.divf %85, %86 : vector<8x1xf32>
    %88 = vector.broadcast %80 : vector<8x1xf32> to vector<8x32xf32>
    %89 = arith.subf %76, %88 : vector<8x32xf32>
    %cst_50 = arith.constant 9.99999974E-6 : f32
    %90 = vector.broadcast %cst_50 : f32 to vector<8x1xf32>
    %91 = arith.addf %87, %90 : vector<8x1xf32>
    %92 = math.rsqrt %91 : vector<8x1xf32>
    %93 = vector.broadcast %92 : vector<8x1xf32> to vector<8x32xf32>
    %94 = arith.mulf %89, %93 : vector<8x32xf32>
    %95 = vector.extract_strided_slice %16 {offsets = [8, 0], sizes = [8, 64], strides = [1, 1]} : vector<16x192xf32> to vector<8x64xf32>
    %96 = vector.extract_strided_slice %16 {offsets = [8, 64], sizes = [8, 64], strides = [1, 1]} : vector<16x192xf32> to vector<8x64xf32>
    %97 = vector.extract_strided_slice %16 {offsets = [8, 128], sizes = [8, 64], strides = [1, 1]} : vector<16x192xf32> to vector<8x64xf32>
    %98 = vector.extract_strided_slice %95 {offsets = [0, 0], sizes = [8, 16], strides = [1, 1]} : vector<8x64xf32> to vector<8x16xf32>
    %99 = vector.extract_strided_slice %96 {offsets = [0, 0], sizes = [8, 16], strides = [1, 1]} : vector<8x64xf32> to vector<8x16xf32>
    %cst_51 = arith.constant dense<0.000000e+00> : vector<8x8xf32>
    %100 = tpu.matmul %98, %99, %cst_51 {dimension_numbers = #tpu.dot_dimension_numbers<[1], [1], [0], [0], [0, 0, 1, 0], [], []>} : vector<8x16xf32>, vector<8x16xf32>, vector<8x8xf32> -> vector<8x8xf32>
    %cst_52 = arith.constant 2.500000e-01 : f32
    %101 = vector.broadcast %cst_52 : f32 to vector<8x8xf32>
    %102 = arith.mulf %100, %101 : vector<8x8xf32>
    %103 = vector.extract_strided_slice %95 {offsets = [0, 16], sizes = [8, 16], strides = [1, 1]} : vector<8x64xf32> to vector<8x16xf32>
    %104 = vector.extract_strided_slice %96 {offsets = [0, 16], sizes = [8, 16], strides = [1, 1]} : vector<8x64xf32> to vector<8x16xf32>
    %cst_53 = arith.constant dense<0.000000e+00> : vector<8x8xf32>
    %105 = tpu.matmul %103, %104, %cst_53 {dimension_numbers = #tpu.dot_dimension_numbers<[1], [1], [0], [0], [0, 0, 1, 0], [], []>} : vector<8x16xf32>, vector<8x16xf32>, vector<8x8xf32> -> vector<8x8xf32>
    %cst_54 = arith.constant 2.500000e-01 : f32
    %106 = vector.broadcast %cst_54 : f32 to vector<8x8xf32>
    %107 = arith.mulf %105, %106 : vector<8x8xf32>
    %108 = vector.extract_strided_slice %95 {offsets = [0, 32], sizes = [8, 16], strides = [1, 1]} : vector<8x64xf32> to vector<8x16xf32>
    %109 = vector.extract_strided_slice %96 {offsets = [0, 32], sizes = [8, 16], strides = [1, 1]} : vector<8x64xf32> to vector<8x16xf32>
    %cst_55 = arith.constant dense<0.000000e+00> : vector<8x8xf32>
    %110 = tpu.matmul %108, %109, %cst_55 {dimension_numbers = #tpu.dot_dimension_numbers<[1], [1], [0], [0], [0, 0, 1, 0], [], []>} : vector<8x16xf32>, vector<8x16xf32>, vector<8x8xf32> -> vector<8x8xf32>
    %cst_56 = arith.constant 2.500000e-01 : f32
    %111 = vector.broadcast %cst_56 : f32 to vector<8x8xf32>
    %112 = arith.mulf %110, %111 : vector<8x8xf32>
    %113 = vector.extract_strided_slice %95 {offsets = [0, 48], sizes = [8, 16], strides = [1, 1]} : vector<8x64xf32> to vector<8x16xf32>
    %114 = vector.extract_strided_slice %96 {offsets = [0, 48], sizes = [8, 16], strides = [1, 1]} : vector<8x64xf32> to vector<8x16xf32>
    %cst_57 = arith.constant dense<0.000000e+00> : vector<8x8xf32>
    %115 = tpu.matmul %113, %114, %cst_57 {dimension_numbers = #tpu.dot_dimension_numbers<[1], [1], [0], [0], [0, 0, 1, 0], [], []>} : vector<8x16xf32>, vector<8x16xf32>, vector<8x8xf32> -> vector<8x8xf32>
    %cst_58 = arith.constant 2.500000e-01 : f32
    %116 = vector.broadcast %cst_58 : f32 to vector<8x8xf32>
    %117 = arith.mulf %115, %116 : vector<8x8xf32>
    %118 = tpu.concatenate %102, %107, %112, %117 in 0 : vector<8x8xf32>, vector<8x8xf32>, vector<8x8xf32>, vector<8x8xf32> -> vector<32x8xf32>
    %cst_59 = arith.constant dense<0xFF800000> : vector<32xf32>
    %119 = vector.multi_reduction <maximumf>, %118, %cst_59 [1] : vector<32x8xf32> to vector<32xf32>
    %120 = vector.shape_cast %119 : vector<32xf32> to vector<32x1xf32>
    %121 = vector.broadcast %120 : vector<32x1xf32> to vector<32x8xf32>
    %122 = arith.subf %118, %121 : vector<32x8xf32>
    %123 = math.exp %122 : vector<32x8xf32>
    %cst_60 = arith.constant dense<0.000000e+00> : vector<32xf32>
    %124 = vector.multi_reduction <add>, %123, %cst_60 [1] : vector<32x8xf32> to vector<32xf32>
    %125 = vector.shape_cast %124 : vector<32xf32> to vector<32x1xf32>
    %126 = tpu.reciprocal %125 {approx = true} : vector<32x1xf32> -> vector<32x1xf32>
    %127 = vector.broadcast %126 : vector<32x1xf32> to vector<32x8xf32>
    %128 = arith.mulf %123, %127 : vector<32x8xf32>
    %cst_61 = arith.constant 0.000000e+00 : f32
    %129 = vector.broadcast %cst_61 : f32 to vector<8x32xf32>
    %130 = vector.extract_strided_slice %128 {offsets = [0, 0], sizes = [8, 8], strides = [1, 1]} : vector<32x8xf32> to vector<8x8xf32>
    %131 = vector.extract_strided_slice %97 {offsets = [0, 0], sizes = [8, 16], strides = [1, 1]} : vector<8x64xf32> to vector<8x16xf32>
    %cst_62 = arith.constant dense<0.000000e+00> : vector<8x16xf32>
    %132 = tpu.matmul %130, %131, %cst_62 {dimension_numbers = #tpu.dot_dimension_numbers<[1], [0], [0], [1], [0, 0, 1, 1], [], []>} : vector<8x8xf32>, vector<8x16xf32>, vector<8x16xf32> -> vector<8x16xf32>
    %133 = vector.extract_strided_slice %5 {offsets = [0, 0], sizes = [16, 32], strides = [1, 1]} : vector<64x32xf32> to vector<16x32xf32>
    %cst_63 = arith.constant dense<0.000000e+00> : vector<8x32xf32>
    %134 = tpu.matmul %132, %133, %cst_63 {dimension_numbers = #tpu.dot_dimension_numbers<[1], [0], [0], [1], [0, 0, 1, 1], [], []>} : vector<8x16xf32>, vector<16x32xf32>, vector<8x32xf32> -> vector<8x32xf32>
    %135 = arith.addf %129, %134 : vector<8x32xf32>
    %136 = vector.extract_strided_slice %128 {offsets = [8, 0], sizes = [8, 8], strides = [1, 1]} : vector<32x8xf32> to vector<8x8xf32>
    %137 = vector.extract_strided_slice %97 {offsets = [0, 16], sizes = [8, 16], strides = [1, 1]} : vector<8x64xf32> to vector<8x16xf32>
    %cst_64 = arith.constant dense<0.000000e+00> : vector<8x16xf32>
    %138 = tpu.matmul %136, %137, %cst_64 {dimension_numbers = #tpu.dot_dimension_numbers<[1], [0], [0], [1], [0, 0, 1, 1], [], []>} : vector<8x8xf32>, vector<8x16xf32>, vector<8x16xf32> -> vector<8x16xf32>
    %139 = vector.extract_strided_slice %5 {offsets = [16, 0], sizes = [16, 32], strides = [1, 1]} : vector<64x32xf32> to vector<16x32xf32>
    %cst_65 = arith.constant dense<0.000000e+00> : vector<8x32xf32>
    %140 = tpu.matmul %138, %139, %cst_65 {dimension_numbers = #tpu.dot_dimension_numbers<[1], [0], [0], [1], [0, 0, 1, 1], [], []>} : vector<8x16xf32>, vector<16x32xf32>, vector<8x32xf32> -> vector<8x32xf32>
    %141 = arith.addf %135, %140 : vector<8x32xf32>
    %142 = vector.extract_strided_slice %128 {offsets = [16, 0], sizes = [8, 8], strides = [1, 1]} : vector<32x8xf32> to vector<8x8xf32>
    %143 = vector.extract_strided_slice %97 {offsets = [0, 32], sizes = [8, 16], strides = [1, 1]} : vector<8x64xf32> to vector<8x16xf32>
    %cst_66 = arith.constant dense<0.000000e+00> : vector<8x16xf32>
    %144 = tpu.matmul %142, %143, %cst_66 {dimension_numbers = #tpu.dot_dimension_numbers<[1], [0], [0], [1], [0, 0, 1, 1], [], []>} : vector<8x8xf32>, vector<8x16xf32>, vector<8x16xf32> -> vector<8x16xf32>
    %145 = vector.extract_strided_slice %5 {offsets = [32, 0], sizes = [16, 32], strides = [1, 1]} : vector<64x32xf32> to vector<16x32xf32>
    %cst_67 = arith.constant dense<0.000000e+00> : vector<8x32xf32>
    %146 = tpu.matmul %144, %145, %cst_67 {dimension_numbers = #tpu.dot_dimension_numbers<[1], [0], [0], [1], [0, 0, 1, 1], [], []>} : vector<8x16xf32>, vector<16x32xf32>, vector<8x32xf32> -> vector<8x32xf32>
    %147 = arith.addf %141, %146 : vector<8x32xf32>
    %148 = vector.extract_strided_slice %128 {offsets = [24, 0], sizes = [8, 8], strides = [1, 1]} : vector<32x8xf32> to vector<8x8xf32>
    %149 = vector.extract_strided_slice %97 {offsets = [0, 48], sizes = [8, 16], strides = [1, 1]} : vector<8x64xf32> to vector<8x16xf32>
    %cst_68 = arith.constant dense<0.000000e+00> : vector<8x16xf32>
    %150 = tpu.matmul %148, %149, %cst_68 {dimension_numbers = #tpu.dot_dimension_numbers<[1], [0], [0], [1], [0, 0, 1, 1], [], []>} : vector<8x8xf32>, vector<8x16xf32>, vector<8x16xf32> -> vector<8x16xf32>
    %151 = vector.extract_strided_slice %5 {offsets = [48, 0], sizes = [16, 32], strides = [1, 1]} : vector<64x32xf32> to vector<16x32xf32>
    %cst_69 = arith.constant dense<0.000000e+00> : vector<8x32xf32>
    %152 = tpu.matmul %150, %151, %cst_69 {dimension_numbers = #tpu.dot_dimension_numbers<[1], [0], [0], [1], [0, 0, 1, 1], [], []>} : vector<8x16xf32>, vector<16x32xf32>, vector<8x32xf32> -> vector<8x32xf32>
    %153 = arith.addf %147, %152 : vector<8x32xf32>
    %154 = arith.addf %153, %3 : vector<8x32xf32>
    %cst_70 = arith.constant dense<0.000000e+00> : vector<8xf32>
    %155 = vector.multi_reduction <add>, %154, %cst_70 [1] : vector<8x32xf32> to vector<8xf32>
    %156 = vector.shape_cast %155 : vector<8xf32> to vector<8x1xf32>
    %cst_71 = arith.constant 3.200000e+01 : f32
    %157 = vector.broadcast %cst_71 : f32 to vector<8x1xf32>
    %158 = arith.divf %156, %157 : vector<8x1xf32>
    %159 = vector.broadcast %158 : vector<8x1xf32> to vector<8x32xf32>
    %160 = arith.subf %154, %159 : vector<8x32xf32>
    %161 = arith.mulf %160, %160 : vector<8x32xf32>
    %cst_72 = arith.constant dense<0.000000e+00> : vector<8xf32>
    %162 = vector.multi_reduction <add>, %161, %cst_72 [1] : vector<8x32xf32> to vector<8xf32>
    %163 = vector.shape_cast %162 : vector<8xf32> to vector<8x1xf32>
    %cst_73 = arith.constant 3.200000e+01 : f32
    %164 = vector.broadcast %cst_73 : f32 to vector<8x1xf32>
    %165 = arith.divf %163, %164 : vector<8x1xf32>
    %166 = vector.broadcast %158 : vector<8x1xf32> to vector<8x32xf32>
    %167 = arith.subf %154, %166 : vector<8x32xf32>
    %cst_74 = arith.constant 9.99999974E-6 : f32
    %168 = vector.broadcast %cst_74 : f32 to vector<8x1xf32>
    %169 = arith.addf %165, %168 : vector<8x1xf32>
    %170 = math.rsqrt %169 : vector<8x1xf32>
    %171 = vector.broadcast %170 : vector<8x1xf32> to vector<8x32xf32>
    %172 = arith.mulf %167, %171 : vector<8x32xf32>
    %173 = tpu.concatenate %94, %172 in 0 : vector<8x32xf32>, vector<8x32xf32> -> vector<16x32xf32>
    %cst_75 = arith.constant dense<0.000000e+00> : vector<16x256xf32>
    %174 = tpu.matmul %173, %6, %cst_75 {dimension_numbers = #tpu.dot_dimension_numbers<[1], [0], [0], [1], [0, 0, 1, 1], [], []>} : vector<16x32xf32>, vector<32x256xf32>, vector<16x256xf32> -> vector<16x256xf32>
    %cst_76 = arith.constant 0.000000e+00 : f32
    %175 = vector.broadcast %cst_76 : f32 to vector<16x256xf32>
    %176 = arith.maximumf %174, %175 : vector<16x256xf32>
    %177 = vector.extract_strided_slice %176 {offsets = [0, 0], sizes = [8, 128], strides = [1, 1]} : vector<16x256xf32> to vector<8x128xf32>
    %cst_77 = arith.constant dense<0.000000e+00> : vector<8x32xf32>
    %178 = tpu.matmul %177, %7, %cst_77 {dimension_numbers = #tpu.dot_dimension_numbers<[1], [0], [0], [1], [0, 0, 1, 1], [], []>} : vector<8x128xf32>, vector<128x32xf32>, vector<8x32xf32> -> vector<8x32xf32>
    %179 = vector.extract_strided_slice %176 {offsets = [8, 128], sizes = [8, 128], strides = [1, 1]} : vector<16x256xf32> to vector<8x128xf32>
    %cst_78 = arith.constant dense<0.000000e+00> : vector<8x32xf32>
    %180 = tpu.matmul %179, %8, %cst_78 {dimension_numbers = #tpu.dot_dimension_numbers<[1], [0], [0], [1], [0, 0, 1, 1], [], []>} : vector<8x128xf32>, vector<128x32xf32>, vector<8x32xf32> -> vector<8x32xf32>
    %181 = arith.addf %178, %94 : vector<8x32xf32>
    %cst_79 = arith.constant dense<0.000000e+00> : vector<8xf32>
    %182 = vector.multi_reduction <add>, %181, %cst_79 [1] : vector<8x32xf32> to vector<8xf32>
    %183 = vector.shape_cast %182 : vector<8xf32> to vector<8x1xf32>
    %cst_80 = arith.constant 3.200000e+01 : f32
    %184 = vector.broadcast %cst_80 : f32 to vector<8x1xf32>
    %185 = arith.divf %183, %184 : vector<8x1xf32>
    %186 = vector.broadcast %185 : vector<8x1xf32> to vector<8x32xf32>
    %187 = arith.subf %181, %186 : vector<8x32xf32>
    %188 = arith.mulf %187, %187 : vector<8x32xf32>
    %cst_81 = arith.constant dense<0.000000e+00> : vector<8xf32>
    %189 = vector.multi_reduction <add>, %188, %cst_81 [1] : vector<8x32xf32> to vector<8xf32>
    %190 = vector.shape_cast %189 : vector<8xf32> to vector<8x1xf32>
    %cst_82 = arith.constant 3.200000e+01 : f32
    %191 = vector.broadcast %cst_82 : f32 to vector<8x1xf32>
    %192 = arith.divf %190, %191 : vector<8x1xf32>
    %193 = vector.broadcast %185 : vector<8x1xf32> to vector<8x32xf32>
    %194 = arith.subf %181, %193 : vector<8x32xf32>
    %cst_83 = arith.constant 9.99999974E-6 : f32
    %195 = vector.broadcast %cst_83 : f32 to vector<8x1xf32>
    %196 = arith.addf %192, %195 : vector<8x1xf32>
    %197 = math.rsqrt %196 : vector<8x1xf32>
    %198 = vector.broadcast %197 : vector<8x1xf32> to vector<8x32xf32>
    %199 = arith.mulf %194, %198 : vector<8x32xf32>
    %200 = arith.addf %180, %172 : vector<8x32xf32>
    %cst_84 = arith.constant dense<0.000000e+00> : vector<8xf32>
    %201 = vector.multi_reduction <add>, %200, %cst_84 [1] : vector<8x32xf32> to vector<8xf32>
    %202 = vector.shape_cast %201 : vector<8xf32> to vector<8x1xf32>
    %cst_85 = arith.constant 3.200000e+01 : f32
    %203 = vector.broadcast %cst_85 : f32 to vector<8x1xf32>
    %204 = arith.divf %202, %203 : vector<8x1xf32>
    %205 = vector.broadcast %204 : vector<8x1xf32> to vector<8x32xf32>
    %206 = arith.subf %200, %205 : vector<8x32xf32>
    %207 = arith.mulf %206, %206 : vector<8x32xf32>
    %cst_86 = arith.constant dense<0.000000e+00> : vector<8xf32>
    %208 = vector.multi_reduction <add>, %207, %cst_86 [1] : vector<8x32xf32> to vector<8xf32>
    %209 = vector.shape_cast %208 : vector<8xf32> to vector<8x1xf32>
    %cst_87 = arith.constant 3.200000e+01 : f32
    %210 = vector.broadcast %cst_87 : f32 to vector<8x1xf32>
    %211 = arith.divf %209, %210 : vector<8x1xf32>
    %212 = vector.broadcast %204 : vector<8x1xf32> to vector<8x32xf32>
    %213 = arith.subf %200, %212 : vector<8x32xf32>
    %cst_88 = arith.constant 9.99999974E-6 : f32
    %214 = vector.broadcast %cst_88 : f32 to vector<8x1xf32>
    %215 = arith.addf %211, %214 : vector<8x1xf32>
    %216 = math.rsqrt %215 : vector<8x1xf32>
    %217 = vector.broadcast %216 : vector<8x1xf32> to vector<8x32xf32>
    %218 = arith.mulf %213, %217 : vector<8x32xf32>
    %219 = tpu.concatenate %199, %218 in 0 : vector<8x32xf32>, vector<8x32xf32> -> vector<16x32xf32>
    %cst_89 = arith.constant dense<0.000000e+00> : vector<16x256xf32>
    %220 = tpu.matmul %219, %9, %cst_89 {dimension_numbers = #tpu.dot_dimension_numbers<[1], [0], [0], [1], [0, 0, 1, 1], [], []>} : vector<16x32xf32>, vector<32x256xf32>, vector<16x256xf32> -> vector<16x256xf32>
    %221 = vector.extract_strided_slice %220 {offsets = [0, 0], sizes = [8, 64], strides = [1, 1]} : vector<16x256xf32> to vector<8x64xf32>
    %222 = vector.extract_strided_slice %220 {offsets = [8, 64], sizes = [8, 64], strides = [1, 1]} : vector<16x256xf32> to vector<8x64xf32>
    %223 = vector.extract_strided_slice %220 {offsets = [0, 128], sizes = [8, 64], strides = [1, 1]} : vector<16x256xf32> to vector<8x64xf32>
    %224 = vector.extract_strided_slice %220 {offsets = [8, 192], sizes = [8, 64], strides = [1, 1]} : vector<16x256xf32> to vector<8x64xf32>
    %225 = vector.extract_strided_slice %221 {offsets = [0, 0], sizes = [8, 16], strides = [1, 1]} : vector<8x64xf32> to vector<8x16xf32>
    %226 = vector.extract_strided_slice %222 {offsets = [0, 0], sizes = [8, 16], strides = [1, 1]} : vector<8x64xf32> to vector<8x16xf32>
    %cst_90 = arith.constant dense<0.000000e+00> : vector<8x8xf32>
    %227 = tpu.matmul %225, %226, %cst_90 {dimension_numbers = #tpu.dot_dimension_numbers<[1], [1], [0], [0], [0, 0, 1, 0], [], []>} : vector<8x16xf32>, vector<8x16xf32>, vector<8x8xf32> -> vector<8x8xf32>
    %cst_91 = arith.constant 2.500000e-01 : f32
    %228 = vector.broadcast %cst_91 : f32 to vector<8x8xf32>
    %229 = arith.mulf %227, %228 : vector<8x8xf32>
    %230 = vector.extract_strided_slice %221 {offsets = [0, 16], sizes = [8, 16], strides = [1, 1]} : vector<8x64xf32> to vector<8x16xf32>
    %231 = vector.extract_strided_slice %222 {offsets = [0, 16], sizes = [8, 16], strides = [1, 1]} : vector<8x64xf32> to vector<8x16xf32>
    %cst_92 = arith.constant dense<0.000000e+00> : vector<8x8xf32>
    %232 = tpu.matmul %230, %231, %cst_92 {dimension_numbers = #tpu.dot_dimension_numbers<[1], [1], [0], [0], [0, 0, 1, 0], [], []>} : vector<8x16xf32>, vector<8x16xf32>, vector<8x8xf32> -> vector<8x8xf32>
    %cst_93 = arith.constant 2.500000e-01 : f32
    %233 = vector.broadcast %cst_93 : f32 to vector<8x8xf32>
    %234 = arith.mulf %232, %233 : vector<8x8xf32>
    %235 = vector.extract_strided_slice %221 {offsets = [0, 32], sizes = [8, 16], strides = [1, 1]} : vector<8x64xf32> to vector<8x16xf32>
    %236 = vector.extract_strided_slice %222 {offsets = [0, 32], sizes = [8, 16], strides = [1, 1]} : vector<8x64xf32> to vector<8x16xf32>
    %cst_94 = arith.constant dense<0.000000e+00> : vector<8x8xf32>
    %237 = tpu.matmul %235, %236, %cst_94 {dimension_numbers = #tpu.dot_dimension_numbers<[1], [1], [0], [0], [0, 0, 1, 0], [], []>} : vector<8x16xf32>, vector<8x16xf32>, vector<8x8xf32> -> vector<8x8xf32>
    %cst_95 = arith.constant 2.500000e-01 : f32
    %238 = vector.broadcast %cst_95 : f32 to vector<8x8xf32>
    %239 = arith.mulf %237, %238 : vector<8x8xf32>
    %240 = vector.extract_strided_slice %221 {offsets = [0, 48], sizes = [8, 16], strides = [1, 1]} : vector<8x64xf32> to vector<8x16xf32>
    %241 = vector.extract_strided_slice %222 {offsets = [0, 48], sizes = [8, 16], strides = [1, 1]} : vector<8x64xf32> to vector<8x16xf32>
    %cst_96 = arith.constant dense<0.000000e+00> : vector<8x8xf32>
    %242 = tpu.matmul %240, %241, %cst_96 {dimension_numbers = #tpu.dot_dimension_numbers<[1], [1], [0], [0], [0, 0, 1, 0], [], []>} : vector<8x16xf32>, vector<8x16xf32>, vector<8x8xf32> -> vector<8x8xf32>
    %cst_97 = arith.constant 2.500000e-01 : f32
    %243 = vector.broadcast %cst_97 : f32 to vector<8x8xf32>
    %244 = arith.mulf %242, %243 : vector<8x8xf32>
    %245 = tpu.concatenate %229, %234, %239, %244 in 0 : vector<8x8xf32>, vector<8x8xf32>, vector<8x8xf32>, vector<8x8xf32> -> vector<32x8xf32>
    %cst_98 = arith.constant dense<0xFF800000> : vector<32xf32>
    %246 = vector.multi_reduction <maximumf>, %245, %cst_98 [1] : vector<32x8xf32> to vector<32xf32>
    %247 = vector.shape_cast %246 : vector<32xf32> to vector<32x1xf32>
    %248 = vector.broadcast %247 : vector<32x1xf32> to vector<32x8xf32>
    %249 = arith.subf %245, %248 : vector<32x8xf32>
    %250 = math.exp %249 : vector<32x8xf32>
    %cst_99 = arith.constant dense<0.000000e+00> : vector<32xf32>
    %251 = vector.multi_reduction <add>, %250, %cst_99 [1] : vector<32x8xf32> to vector<32xf32>
    %252 = vector.shape_cast %251 : vector<32xf32> to vector<32x1xf32>
    %253 = tpu.reciprocal %252 {approx = true} : vector<32x1xf32> -> vector<32x1xf32>
    %254 = vector.broadcast %253 : vector<32x1xf32> to vector<32x8xf32>
    %255 = arith.mulf %250, %254 : vector<32x8xf32>
    %cst_100 = arith.constant 0.000000e+00 : f32
    %256 = vector.broadcast %cst_100 : f32 to vector<8x32xf32>
    %cst_101 = arith.constant 0.000000e+00 : f32
    %257 = vector.broadcast %cst_101 : f32 to vector<8x32xf32>
    %258 = vector.extract_strided_slice %255 {offsets = [0, 0], sizes = [8, 8], strides = [1, 1]} : vector<32x8xf32> to vector<8x8xf32>
    %259 = vector.extract_strided_slice %223 {offsets = [0, 0], sizes = [8, 16], strides = [1, 1]} : vector<8x64xf32> to vector<8x16xf32>
    %cst_102 = arith.constant dense<0.000000e+00> : vector<8x16xf32>
    %260 = tpu.matmul %258, %259, %cst_102 {dimension_numbers = #tpu.dot_dimension_numbers<[1], [0], [0], [1], [0, 0, 1, 1], [], []>} : vector<8x8xf32>, vector<8x16xf32>, vector<8x16xf32> -> vector<8x16xf32>
    %261 = vector.extract_strided_slice %224 {offsets = [0, 0], sizes = [8, 16], strides = [1, 1]} : vector<8x64xf32> to vector<8x16xf32>
    %cst_103 = arith.constant dense<0.000000e+00> : vector<8x16xf32>
    %262 = tpu.matmul %258, %261, %cst_103 {dimension_numbers = #tpu.dot_dimension_numbers<[1], [0], [0], [1], [0, 0, 1, 1], [], []>} : vector<8x8xf32>, vector<8x16xf32>, vector<8x16xf32> -> vector<8x16xf32>
    %263 = vector.extract_strided_slice %10 {offsets = [0, 0], sizes = [16, 32], strides = [1, 1]} : vector<64x32xf32> to vector<16x32xf32>
    %cst_104 = arith.constant dense<0.000000e+00> : vector<8x32xf32>
    %264 = tpu.matmul %260, %263, %cst_104 {dimension_numbers = #tpu.dot_dimension_numbers<[1], [0], [0], [1], [0, 0, 1, 1], [], []>} : vector<8x16xf32>, vector<16x32xf32>, vector<8x32xf32> -> vector<8x32xf32>
    %265 = arith.addf %256, %264 : vector<8x32xf32>
    %266 = vector.extract_strided_slice %11 {offsets = [0, 0], sizes = [16, 32], strides = [1, 1]} : vector<64x32xf32> to vector<16x32xf32>
    %cst_105 = arith.constant dense<0.000000e+00> : vector<8x32xf32>
    %267 = tpu.matmul %262, %266, %cst_105 {dimension_numbers = #tpu.dot_dimension_numbers<[1], [0], [0], [1], [0, 0, 1, 1], [], []>} : vector<8x16xf32>, vector<16x32xf32>, vector<8x32xf32> -> vector<8x32xf32>
    %268 = arith.addf %257, %267 : vector<8x32xf32>
    %269 = vector.extract_strided_slice %255 {offsets = [8, 0], sizes = [8, 8], strides = [1, 1]} : vector<32x8xf32> to vector<8x8xf32>
    %270 = vector.extract_strided_slice %223 {offsets = [0, 16], sizes = [8, 16], strides = [1, 1]} : vector<8x64xf32> to vector<8x16xf32>
    %cst_106 = arith.constant dense<0.000000e+00> : vector<8x16xf32>
    %271 = tpu.matmul %269, %270, %cst_106 {dimension_numbers = #tpu.dot_dimension_numbers<[1], [0], [0], [1], [0, 0, 1, 1], [], []>} : vector<8x8xf32>, vector<8x16xf32>, vector<8x16xf32> -> vector<8x16xf32>
    %272 = vector.extract_strided_slice %224 {offsets = [0, 16], sizes = [8, 16], strides = [1, 1]} : vector<8x64xf32> to vector<8x16xf32>
    %cst_107 = arith.constant dense<0.000000e+00> : vector<8x16xf32>
    %273 = tpu.matmul %269, %272, %cst_107 {dimension_numbers = #tpu.dot_dimension_numbers<[1], [0], [0], [1], [0, 0, 1, 1], [], []>} : vector<8x8xf32>, vector<8x16xf32>, vector<8x16xf32> -> vector<8x16xf32>
    %274 = vector.extract_strided_slice %10 {offsets = [16, 0], sizes = [16, 32], strides = [1, 1]} : vector<64x32xf32> to vector<16x32xf32>
    %cst_108 = arith.constant dense<0.000000e+00> : vector<8x32xf32>
    %275 = tpu.matmul %271, %274, %cst_108 {dimension_numbers = #tpu.dot_dimension_numbers<[1], [0], [0], [1], [0, 0, 1, 1], [], []>} : vector<8x16xf32>, vector<16x32xf32>, vector<8x32xf32> -> vector<8x32xf32>
    %276 = arith.addf %265, %275 : vector<8x32xf32>
    %277 = vector.extract_strided_slice %11 {offsets = [16, 0], sizes = [16, 32], strides = [1, 1]} : vector<64x32xf32> to vector<16x32xf32>
    %cst_109 = arith.constant dense<0.000000e+00> : vector<8x32xf32>
    %278 = tpu.matmul %273, %277, %cst_109 {dimension_numbers = #tpu.dot_dimension_numbers<[1], [0], [0], [1], [0, 0, 1, 1], [], []>} : vector<8x16xf32>, vector<16x32xf32>, vector<8x32xf32> -> vector<8x32xf32>
    %279 = arith.addf %268, %278 : vector<8x32xf32>
    %280 = vector.extract_strided_slice %255 {offsets = [16, 0], sizes = [8, 8], strides = [1, 1]} : vector<32x8xf32> to vector<8x8xf32>
    %281 = vector.extract_strided_slice %223 {offsets = [0, 32], sizes = [8, 16], strides = [1, 1]} : vector<8x64xf32> to vector<8x16xf32>
    %cst_110 = arith.constant dense<0.000000e+00> : vector<8x16xf32>
    %282 = tpu.matmul %280, %281, %cst_110 {dimension_numbers = #tpu.dot_dimension_numbers<[1], [0], [0], [1], [0, 0, 1, 1], [], []>} : vector<8x8xf32>, vector<8x16xf32>, vector<8x16xf32> -> vector<8x16xf32>
    %283 = vector.extract_strided_slice %224 {offsets = [0, 32], sizes = [8, 16], strides = [1, 1]} : vector<8x64xf32> to vector<8x16xf32>
    %cst_111 = arith.constant dense<0.000000e+00> : vector<8x16xf32>
    %284 = tpu.matmul %280, %283, %cst_111 {dimension_numbers = #tpu.dot_dimension_numbers<[1], [0], [0], [1], [0, 0, 1, 1], [], []>} : vector<8x8xf32>, vector<8x16xf32>, vector<8x16xf32> -> vector<8x16xf32>
    %285 = vector.extract_strided_slice %10 {offsets = [32, 0], sizes = [16, 32], strides = [1, 1]} : vector<64x32xf32> to vector<16x32xf32>
    %cst_112 = arith.constant dense<0.000000e+00> : vector<8x32xf32>
    %286 = tpu.matmul %282, %285, %cst_112 {dimension_numbers = #tpu.dot_dimension_numbers<[1], [0], [0], [1], [0, 0, 1, 1], [], []>} : vector<8x16xf32>, vector<16x32xf32>, vector<8x32xf32> -> vector<8x32xf32>
    %287 = arith.addf %276, %286 : vector<8x32xf32>
    %288 = vector.extract_strided_slice %11 {offsets = [32, 0], sizes = [16, 32], strides = [1, 1]} : vector<64x32xf32> to vector<16x32xf32>
    %cst_113 = arith.constant dense<0.000000e+00> : vector<8x32xf32>
    %289 = tpu.matmul %284, %288, %cst_113 {dimension_numbers = #tpu.dot_dimension_numbers<[1], [0], [0], [1], [0, 0, 1, 1], [], []>} : vector<8x16xf32>, vector<16x32xf32>, vector<8x32xf32> -> vector<8x32xf32>
    %290 = arith.addf %279, %289 : vector<8x32xf32>
    %291 = vector.extract_strided_slice %255 {offsets = [24, 0], sizes = [8, 8], strides = [1, 1]} : vector<32x8xf32> to vector<8x8xf32>
    %292 = vector.extract_strided_slice %223 {offsets = [0, 48], sizes = [8, 16], strides = [1, 1]} : vector<8x64xf32> to vector<8x16xf32>
    %cst_114 = arith.constant dense<0.000000e+00> : vector<8x16xf32>
    %293 = tpu.matmul %291, %292, %cst_114 {dimension_numbers = #tpu.dot_dimension_numbers<[1], [0], [0], [1], [0, 0, 1, 1], [], []>} : vector<8x8xf32>, vector<8x16xf32>, vector<8x16xf32> -> vector<8x16xf32>
    %294 = vector.extract_strided_slice %224 {offsets = [0, 48], sizes = [8, 16], strides = [1, 1]} : vector<8x64xf32> to vector<8x16xf32>
    %cst_115 = arith.constant dense<0.000000e+00> : vector<8x16xf32>
    %295 = tpu.matmul %291, %294, %cst_115 {dimension_numbers = #tpu.dot_dimension_numbers<[1], [0], [0], [1], [0, 0, 1, 1], [], []>} : vector<8x8xf32>, vector<8x16xf32>, vector<8x16xf32> -> vector<8x16xf32>
    %296 = vector.extract_strided_slice %10 {offsets = [48, 0], sizes = [16, 32], strides = [1, 1]} : vector<64x32xf32> to vector<16x32xf32>
    %cst_116 = arith.constant dense<0.000000e+00> : vector<8x32xf32>
    %297 = tpu.matmul %293, %296, %cst_116 {dimension_numbers = #tpu.dot_dimension_numbers<[1], [0], [0], [1], [0, 0, 1, 1], [], []>} : vector<8x16xf32>, vector<16x32xf32>, vector<8x32xf32> -> vector<8x32xf32>
    %298 = arith.addf %287, %297 : vector<8x32xf32>
    %299 = vector.extract_strided_slice %11 {offsets = [48, 0], sizes = [16, 32], strides = [1, 1]} : vector<64x32xf32> to vector<16x32xf32>
    %cst_117 = arith.constant dense<0.000000e+00> : vector<8x32xf32>
    %300 = tpu.matmul %295, %299, %cst_117 {dimension_numbers = #tpu.dot_dimension_numbers<[1], [0], [0], [1], [0, 0, 1, 1], [], []>} : vector<8x16xf32>, vector<16x32xf32>, vector<8x32xf32> -> vector<8x32xf32>
    %301 = arith.addf %290, %300 : vector<8x32xf32>
    %302 = arith.addf %298, %199 : vector<8x32xf32>
    %cst_118 = arith.constant dense<0.000000e+00> : vector<8xf32>
    %303 = vector.multi_reduction <add>, %302, %cst_118 [1] : vector<8x32xf32> to vector<8xf32>
    %304 = vector.shape_cast %303 : vector<8xf32> to vector<8x1xf32>
    %cst_119 = arith.constant 3.200000e+01 : f32
    %305 = vector.broadcast %cst_119 : f32 to vector<8x1xf32>
    %306 = arith.divf %304, %305 : vector<8x1xf32>
    %307 = vector.broadcast %306 : vector<8x1xf32> to vector<8x32xf32>
    %308 = arith.subf %302, %307 : vector<8x32xf32>
    %309 = arith.mulf %308, %308 : vector<8x32xf32>
    %cst_120 = arith.constant dense<0.000000e+00> : vector<8xf32>
    %310 = vector.multi_reduction <add>, %309, %cst_120 [1] : vector<8x32xf32> to vector<8xf32>
    %311 = vector.shape_cast %310 : vector<8xf32> to vector<8x1xf32>
    %cst_121 = arith.constant 3.200000e+01 : f32
    %312 = vector.broadcast %cst_121 : f32 to vector<8x1xf32>
    %313 = arith.divf %311, %312 : vector<8x1xf32>
    %314 = vector.broadcast %306 : vector<8x1xf32> to vector<8x32xf32>
    %315 = arith.subf %302, %314 : vector<8x32xf32>
    %cst_122 = arith.constant 9.99999974E-6 : f32
    %316 = vector.broadcast %cst_122 : f32 to vector<8x1xf32>
    %317 = arith.addf %313, %316 : vector<8x1xf32>
    %318 = math.rsqrt %317 : vector<8x1xf32>
    %319 = vector.broadcast %318 : vector<8x1xf32> to vector<8x32xf32>
    %320 = arith.mulf %315, %319 : vector<8x32xf32>
    %321 = arith.addf %301, %218 : vector<8x32xf32>
    %cst_123 = arith.constant dense<0.000000e+00> : vector<8xf32>
    %322 = vector.multi_reduction <add>, %321, %cst_123 [1] : vector<8x32xf32> to vector<8xf32>
    %323 = vector.shape_cast %322 : vector<8xf32> to vector<8x1xf32>
    %cst_124 = arith.constant 3.200000e+01 : f32
    %324 = vector.broadcast %cst_124 : f32 to vector<8x1xf32>
    %325 = arith.divf %323, %324 : vector<8x1xf32>
    %326 = vector.broadcast %325 : vector<8x1xf32> to vector<8x32xf32>
    %327 = arith.subf %321, %326 : vector<8x32xf32>
    %328 = arith.mulf %327, %327 : vector<8x32xf32>
    %cst_125 = arith.constant dense<0.000000e+00> : vector<8xf32>
    %329 = vector.multi_reduction <add>, %328, %cst_125 [1] : vector<8x32xf32> to vector<8xf32>
    %330 = vector.shape_cast %329 : vector<8xf32> to vector<8x1xf32>
    %cst_126 = arith.constant 3.200000e+01 : f32
    %331 = vector.broadcast %cst_126 : f32 to vector<8x1xf32>
    %332 = arith.divf %330, %331 : vector<8x1xf32>
    %333 = vector.broadcast %325 : vector<8x1xf32> to vector<8x32xf32>
    %334 = arith.subf %321, %333 : vector<8x32xf32>
    %cst_127 = arith.constant 9.99999974E-6 : f32
    %335 = vector.broadcast %cst_127 : f32 to vector<8x1xf32>
    %336 = arith.addf %332, %335 : vector<8x1xf32>
    %337 = math.rsqrt %336 : vector<8x1xf32>
    %338 = vector.broadcast %337 : vector<8x1xf32> to vector<8x32xf32>
    %339 = arith.mulf %334, %338 : vector<8x32xf32>
    %340 = tpu.concatenate %258, %269, %280, %291 in 1 : vector<8x8xf32>, vector<8x8xf32>, vector<8x8xf32>, vector<8x8xf32> -> vector<8x32xf32>
    %341 = vector.shape_cast %340 : vector<8x32xf32> to vector<1x8x32xf32>
    %c0_128 = arith.constant 0 : index
    %c0_129 = arith.constant 0 : index
    %c0_130 = arith.constant 0 : index
    %342 = vector.load %arg16[%c0_128, %c0_129, %c0_130] : memref<1x8x32xf32, #tpu.memory_space<vmem>>, vector<1x8x32xf32>
    tpu.vector_store %arg16[%c0_128, %c0_129, %c0_130], %341 {strides = array<i32>} : memref<1x8x32xf32, #tpu.memory_space<vmem>>, vector<1x8x32xf32>,
    %343 = tpu.concatenate %320, %339 in 0 : vector<8x32xf32>, vector<8x32xf32> -> vector<16x32xf32>
    %cst_131 = arith.constant dense<0.000000e+00> : vector<16x256xf32>
    %344 = tpu.matmul %343, %12, %cst_131 {dimension_numbers = #tpu.dot_dimension_numbers<[1], [0], [0], [1], [0, 0, 1, 1], [], []>} : vector<16x32xf32>, vector<32x256xf32>, vector<16x256xf32> -> vector<16x256xf32>
    %cst_132 = arith.constant 0.000000e+00 : f32
    %345 = vector.broadcast %cst_132 : f32 to vector<16x256xf32>
    %346 = arith.maximumf %344, %345 : vector<16x256xf32>
    %347 = vector.extract_strided_slice %346 {offsets = [0, 0], sizes = [8, 128], strides = [1, 1]} : vector<16x256xf32> to vector<8x128xf32>
    %cst_133 = arith.constant dense<0.000000e+00> : vector<8x32xf32>
    %348 = tpu.matmul %347, %13, %cst_133 {dimension_numbers = #tpu.dot_dimension_numbers<[1], [0], [0], [1], [0, 0, 1, 1], [], []>} : vector<8x128xf32>, vector<128x32xf32>, vector<8x32xf32> -> vector<8x32xf32>
    %349 = vector.extract_strided_slice %346 {offsets = [8, 128], sizes = [8, 128], strides = [1, 1]} : vector<16x256xf32> to vector<8x128xf32>
    %cst_134 = arith.constant dense<0.000000e+00> : vector<8x32xf32>
    %350 = tpu.matmul %349, %14, %cst_134 {dimension_numbers = #tpu.dot_dimension_numbers<[1], [0], [0], [1], [0, 0, 1, 1], [], []>} : vector<8x128xf32>, vector<128x32xf32>, vector<8x32xf32> -> vector<8x32xf32>
    %351 = arith.addf %348, %320 : vector<8x32xf32>
    %cst_135 = arith.constant dense<0.000000e+00> : vector<8xf32>
    %352 = vector.multi_reduction <add>, %351, %cst_135 [1] : vector<8x32xf32> to vector<8xf32>
    %353 = vector.shape_cast %352 : vector<8xf32> to vector<8x1xf32>
    %cst_136 = arith.constant 3.200000e+01 : f32
    %354 = vector.broadcast %cst_136 : f32 to vector<8x1xf32>
    %355 = arith.divf %353, %354 : vector<8x1xf32>
    %356 = vector.broadcast %355 : vector<8x1xf32> to vector<8x32xf32>
    %357 = arith.subf %351, %356 : vector<8x32xf32>
    %358 = arith.mulf %357, %357 : vector<8x32xf32>
    %cst_137 = arith.constant dense<0.000000e+00> : vector<8xf32>
    %359 = vector.multi_reduction <add>, %358, %cst_137 [1] : vector<8x32xf32> to vector<8xf32>
    %360 = vector.shape_cast %359 : vector<8xf32> to vector<8x1xf32>
    %cst_138 = arith.constant 3.200000e+01 : f32
    %361 = vector.broadcast %cst_138 : f32 to vector<8x1xf32>
    %362 = arith.divf %360, %361 : vector<8x1xf32>
    %363 = vector.broadcast %355 : vector<8x1xf32> to vector<8x32xf32>
    %364 = arith.subf %351, %363 : vector<8x32xf32>
    %cst_139 = arith.constant 9.99999974E-6 : f32
    %365 = vector.broadcast %cst_139 : f32 to vector<8x1xf32>
    %366 = arith.addf %362, %365 : vector<8x1xf32>
    %367 = math.rsqrt %366 : vector<8x1xf32>
    %368 = vector.broadcast %367 : vector<8x1xf32> to vector<8x32xf32>
    %369 = arith.mulf %364, %368 : vector<8x32xf32>
    %370 = arith.addf %350, %339 : vector<8x32xf32>
    %cst_140 = arith.constant dense<0.000000e+00> : vector<8xf32>
    %371 = vector.multi_reduction <add>, %370, %cst_140 [1] : vector<8x32xf32> to vector<8xf32>
    %372 = vector.shape_cast %371 : vector<8xf32> to vector<8x1xf32>
    %cst_141 = arith.constant 3.200000e+01 : f32
    %373 = vector.broadcast %cst_141 : f32 to vector<8x1xf32>
    %374 = arith.divf %372, %373 : vector<8x1xf32>
    %375 = vector.broadcast %374 : vector<8x1xf32> to vector<8x32xf32>
    %376 = arith.subf %370, %375 : vector<8x32xf32>
    %377 = arith.mulf %376, %376 : vector<8x32xf32>
    %cst_142 = arith.constant dense<0.000000e+00> : vector<8xf32>
    %378 = vector.multi_reduction <add>, %377, %cst_142 [1] : vector<8x32xf32> to vector<8xf32>
    %379 = vector.shape_cast %378 : vector<8xf32> to vector<8x1xf32>
    %cst_143 = arith.constant 3.200000e+01 : f32
    %380 = vector.broadcast %cst_143 : f32 to vector<8x1xf32>
    %381 = arith.divf %379, %380 : vector<8x1xf32>
    %382 = vector.broadcast %374 : vector<8x1xf32> to vector<8x32xf32>
    %383 = arith.subf %370, %382 : vector<8x32xf32>
    %cst_144 = arith.constant 9.99999974E-6 : f32
    %384 = vector.broadcast %cst_144 : f32 to vector<8x1xf32>
    %385 = arith.addf %381, %384 : vector<8x1xf32>
    %386 = math.rsqrt %385 : vector<8x1xf32>
    %387 = vector.broadcast %386 : vector<8x1xf32> to vector<8x32xf32>
    %388 = arith.mulf %383, %387 : vector<8x32xf32>
    %389 = vector.shape_cast %369 : vector<8x32xf32> to vector<1x8x32xf32>
    %c0_145 = arith.constant 0 : index
    %c0_146 = arith.constant 0 : index
    %c0_147 = arith.constant 0 : index
    %390 = vector.load %arg14[%c0_145, %c0_146, %c0_147] : memref<1x8x32xf32, #tpu.memory_space<vmem>>, vector<1x8x32xf32>
    tpu.vector_store %arg14[%c0_145, %c0_146, %c0_147], %389 {strides = array<i32>} : memref<1x8x32xf32, #tpu.memory_space<vmem>>, vector<1x8x32xf32>,
    %391 = vector.shape_cast %388 : vector<8x32xf32> to vector<1x8x32xf32>
    %c0_148 = arith.constant 0 : index
    %c0_149 = arith.constant 0 : index
    %c0_150 = arith.constant 0 : index
    %392 = vector.load %arg15[%c0_148, %c0_149, %c0_150] : memref<1x8x32xf32, #tpu.memory_space<vmem>>, vector<1x8x32xf32>
    tpu.vector_store %arg15[%c0_148, %c0_149, %c0_150], %391 {strides = array<i32>} : memref<1x8x32xf32, #tpu.memory_space<vmem>>, vector<1x8x32xf32>,
    return
  }
  func.func @transform_0(%arg0: i32) -> (i32, i32, i32) {
    %c0_i32 = arith.constant 0 : i32
    %c0_i32_0 = arith.constant 0 : i32
    %c0_i32_1 = arith.constant 0 : i32
    return %arg0, %c0_i32, %c0_i32_0 : i32, i32, i32
  }
  func.func @transform_1(%arg0: i32) -> (i32, i32, i32) {
    %c0_i32 = arith.constant 0 : i32
    %c0_i32_0 = arith.constant 0 : i32
    %c0_i32_1 = arith.constant 0 : i32
    return %arg0, %c0_i32, %c0_i32_0 : i32, i32, i32
  }
  func.func @transform_2(%arg0: i32) -> (i32, i32) {
    %c0_i32 = arith.constant 0 : i32
    %c0_i32_0 = arith.constant 0 : i32
    %c0_i32_1 = arith.constant 0 : i32
    return %c0_i32, %c0_i32_0 : i32, i32
  }
  func.func @transform_3(%arg0: i32) -> (i32, i32) {
    %c0_i32 = arith.constant 0 : i32
    %c0_i32_0 = arith.constant 0 : i32
    %c0_i32_1 = arith.constant 0 : i32
    return %c0_i32, %c0_i32_0 : i32, i32
  }
  func.func @transform_4(%arg0: i32) -> (i32, i32) {
    %c0_i32 = arith.constant 0 : i32
    %c0_i32_0 = arith.constant 0 : i32
    %c0_i32_1 = arith.constant 0 : i32
    return %c0_i32, %c0_i32_0 : i32, i32
  }
  func.func @transform_5(%arg0: i32) -> (i32, i32) {
    %c0_i32 = arith.constant 0 : i32
    %c0_i32_0 = arith.constant 0 : i32
    %c0_i32_1 = arith.constant 0 : i32
    return %c0_i32, %c0_i32_0 : i32, i32
  }
  func.func @transform_6(%arg0: i32) -> (i32, i32) {
    %c0_i32 = arith.constant 0 : i32
    %c0_i32_0 = arith.constant 0 : i32
    %c0_i32_1 = arith.constant 0 : i32
    return %c0_i32, %c0_i32_0 : i32, i32
  }
  func.func @transform_7(%arg0: i32) -> (i32, i32) {
    %c0_i32 = arith.constant 0 : i32
    %c0_i32_0 = arith.constant 0 : i32
    %c0_i32_1 = arith.constant 0 : i32
    return %c0_i32, %c0_i32_0 : i32, i32
  }
  func.func @transform_8(%arg0: i32) -> (i32, i32) {
    %c0_i32 = arith.constant 0 : i32
    %c0_i32_0 = arith.constant 0 : i32
    %c0_i32_1 = arith.constant 0 : i32
    return %c0_i32, %c0_i32_0 : i32, i32
  }
  func.func @transform_9(%arg0: i32) -> (i32, i32) {
    %c0_i32 = arith.constant 0 : i32
    %c0_i32_0 = arith.constant 0 : i32
    %c0_i32_1 = arith.constant 0 : i32
    return %c0_i32, %c0_i32_0 : i32, i32
  }
  func.func @transform_10(%arg0: i32) -> (i32, i32) {
    %c0_i32 = arith.constant 0 : i32
    %c0_i32_0 = arith.constant 0 : i32
    %c0_i32_1 = arith.constant 0 : i32
    return %c0_i32, %c0_i32_0 : i32, i32
  }
  func.func @transform_11(%arg0: i32) -> (i32, i32) {
    %c0_i32 = arith.constant 0 : i32
    %c0_i32_0 = arith.constant 0 : i32
    %c0_i32_1 = arith.constant 0 : i32
    return %c0_i32, %c0_i32_0 : i32, i32
  }
  func.func @transform_12(%arg0: i32) -> (i32, i32) {
    %c0_i32 = arith.constant 0 : i32
    %c0_i32_0 = arith.constant 0 : i32
    %c0_i32_1 = arith.constant 0 : i32
    return %c0_i32, %c0_i32_0 : i32, i32
  }
  func.func @transform_13(%arg0: i32) -> (i32, i32, i32) {
    %c0_i32 = arith.constant 0 : i32
    %c0_i32_0 = arith.constant 0 : i32
    %c0_i32_1 = arith.constant 0 : i32
    return %arg0, %c0_i32, %c0_i32_0 : i32, i32, i32
  }
  func.func @transform_14(%arg0: i32) -> (i32, i32, i32) {
    %c0_i32 = arith.constant 0 : i32
    %c0_i32_0 = arith.constant 0 : i32
    %c0_i32_1 = arith.constant 0 : i32
    return %arg0, %c0_i32, %c0_i32_0 : i32, i32, i32
  }
  func.func @transform_15(%arg0: i32) -> (i32, i32, i32) {
    %c0_i32 = arith.constant 0 : i32
    %c0_i32_0 = arith.constant 0 : i32
    %c0_i32_1 = arith.constant 0 : i32
    return %arg0, %c0_i32, %c0_i32_0 : i32, i32, i32
  }
}

</mosaic_0001>

<bundles_post_ra>
// kernel: encoder_layer.1
= control target key start
LH: loop header
LB: loop body
LE: loop exit
PB: predicated region body
PF: predicated region fallthrough
CT: control target
= control target key end

     0   :  { %s7096_s0 = inlined_call_operand.vmem [shape: f32[2,8,32], index: 0, kind: input, shape index: {}]   ;;  %s7097_s1 = inlined_call_operand.vmem [shape: f32[2,8,32], index: 1, kind: input, shape index: {}]   ;;  %s7098_s2 = inlined_call_operand.vmem [shape: f32[32,192], index: 2, kind: input, shape index: {}]   ;;  %s7099_s3 = inlined_call_operand.vmem [shape: f32[64,32], index: 3, kind: input, shape index: {}]   ;;  %s7100_s4 = inlined_call_operand.vmem [shape: f32[32,256], index: 4, kind: input, shape index: {}]   ;;  %s7101_s5 = inlined_call_operand.vmem [shape: f32[128,32], index: 5, kind: input, shape index: {}]   ;;  %s7102_s6 = inlined_call_operand.vmem [shape: f32[128,32], index: 6, kind: input, shape index: {}]   ;;  %s7103_s7 = inlined_call_operand.vmem [shape: f32[32,256], index: 7, kind: input, shape index: {}]   ;;  %s7104_s8 = inlined_call_operand.vmem [shape: f32[64,32], index: 8, kind: input, shape index: {}]   ;;  %s7105_s9 = inlined_call_operand.vmem [shape: f32[64,32], index: 9, kind: input, shape index: {}]   ;;  %s7106_s10 = inlined_call_operand.vmem [shape: f32[32,256], index: 10, kind: input, shape index: {}]   ;;  %s7107_s11 = inlined_call_operand.vmem [shape: f32[128,32], index: 11, kind: input, shape index: {}]   ;;  %s7108_s12 = inlined_call_operand.vmem [shape: f32[128,32], index: 12, kind: input, shape index: {}]   ;;  %s7109_s13 = inlined_call_operand.hbm [shape: f32[2,8,32], index: 13, kind: output, shape index: {0}]   ;;  %s7110_s14 = inlined_call_operand.hbm [shape: f32[2,8,32], index: 14, kind: output, shape index: {1}]   ;;  %s7111_s15 = inlined_call_operand.vmem [shape: f32[2,8,32], index: 15, kind: output, shape index: {2}]  }
   0x1   :  { %7130 = sst [smem:[#allocation12_spill]] %s7096_s0 }
   0x2   :  { %7131 = sst [smem:[#allocation13_spill]] %s7097_s1 }
   0x3   :  { %7132 = sst [smem:[#allocation14_spill]] %s7098_s2 }
   0x4   :  { %7133 = sst [smem:[#allocation15_spill]] %s7099_s3 }
   0x5   :  { %7134 = sst [smem:[#allocation16_spill]] %s7100_s4 }
   0x6   :  { %7135 = sst [smem:[#allocation17_spill]] %s7101_s5 }
   0x7   :  { %21 = vsyncpa [#allocation3], 0 }
   0x8   :  { %23 = vsyncpa [#allocation3 + $0x1], 0 }
   0x9   :  { %24 = vsyncpa [#allocation5], 0 }
   0xa   :  { %26 = vsyncpa [#allocation5 + $0x1], 0  ;;  %s6138_s18 = smov 0   ;;  %s6140_s19 = smov 0  }
   0xb   :  { %s6142_s20 = smov 0   ;;  %s6144_s21 = smov 0  }
   0xc LB: > { %7136 = sst [smem:[#allocation8_spill]] %s6038_s20  ;;  %s6159_s22 = sadd.s32 4294967295, %s6042_s21   ;;  %s6042_s21 = sphi %s6144_s21, %s7156_s21   ;;  %s6038_s20 = sphi %s6142_s20, %s7158_s20   ;;  %s6034_s19 = sphi %s6140_s19, %s7160_s19   ;;  %s6030_s18 = sphi %s6138_s18, %s7159_s18  }
   0xd   : > { %s5009_s23 = sadd.s32 4294967294, %s6042_s21   ;;  %s6163_s24 = sadd.s32 1, %s6042_s21  }
   0xe   : > { %7137 = sst [smem:[#allocation9_spill]] %s6163_s24  ;;  %s322_s25 = sadd.s32 1, %s6038_s20 }
   0xf   : > { %s319_s26 = ssub.s32 %s6042_s21, %s6163_s24  ;;  %p332_p0 = scmp.ne.s32.totalorder %s6038_s20, %s6034_s19 }
  0x10   : > { %p320_p1 = scmp.eq.s32.totalorder %s319_s26, 0  ;;  %p333_p2 = scmp.eq.s32.totalorder %s6159_s22, 1 }
  0x11   : > { %p338_p3 = scmp.ne.s32.totalorder %s6034_s19, %s6030_s18  ;;  %p339_p4 = scmp.eq.s32.totalorder %s5009_s23, 1 }
  0x12   : > { %s6174_s27 = scalar_select %p320_p1, %s6038_s20, %s322_s25  }
  0x13   : > { %p6176_p5 = por %p333_p2, %p332_p0  ;;  %p6180_p6 = por %p339_p4, %p338_p3 }
  0x14   : > { %7138 = sst [smem:[#allocation10_spill]] %s6174_s27  ;;  %p5012_p7 = scmp.ge.s32.totalorder %s6042_s21, 1 }
  0x15   : > { %s7140_s29 = scalar_select %p6180_p6, 1, 0 }
  0x16   : > { %p456_p8 = scmp.lt.s32.totalorder %s6042_s21, 3 }
  0x17   : > { %7141 = sst [smem:[#allocation11_spill]] %s7140_s29 }
  0x18   : > { %p457_p9 = pnand %p5012_p7, %p456_p8 }
  0x19   : > { %s7142_s2 = sld [smem:[#allocation14_spill]] (!%p457_p9)  ;;  %p516_p10 = scmp.lt.s32.totalorder (!%p457_p9), %s6159_s22, 1  ;;  %v6044_v7 = vmov (!%p457_p9), 0.0   ;;  %vm650_vm0 = vcmask (!%p457_p9), 261120   ;;  %vm6045_vm1 = vmmov (!%p457_p9), 0   ;;  %vm737_vm2 = vcmask (!%p457_p9), 130048  }
  0x1a   : > { %460 = sbr.rel (%p457_p9) target bundleno = 6377 (0x18e9), region = 72  ;;  %721 = vmatprep.mubr.f32.mxu0 (!%p457_p9), %v6044_v7  ;;  %5260 = vmatprep.subr.mxu1 (!%p457_p9), %v6044_v7  ;;  %s7143_s0 = sld [smem:[#allocation12_spill]] (!%p457_p9)  ;;  %vm1050_vm3 = vcmask (!%p457_p9), 64512   ;;  %v6053_v60 = vmov (!%p457_p9), 0.0|0.0   ;;  %vm4589_vm4 = vcmask (!%p457_p9), 195584  }
  0x1b   : > { %5262 = vmatprep.mubr.msk.f32.mxu1 (!%p457_p9), %vm6045_vm1, %v6044_v7  ;;  %s7128_s16 = smov (!%p457_p9), 112   ;;  %s7120_s17 = smov (!%p457_p9), 64  }
  0x1c   : > { %s7116_s23 = smov (!%p457_p9), 32   ;;  %s7122_s20 = smov (!%p457_p9), 48  }
  0x1d   : > { %s7118_s27 = smov (!%p457_p9), 16   ;;  %s7124_s25 = smov (!%p457_p9), 80  }
  0x1e   : > { %s7144_s1 = sld [smem:[#allocation13_spill]] (!%p457_p9)  ;;  %s7146_s3 = sld [smem:[#allocation15_spill]] (!%p457_p9) }
  0x1f   : > { %v531_v0 = vld [vmem:[%s7142_s2 + $0x8] sm:$0xff] (!%p457_p9)  ;;  %v533_v1 = vld [vmem:[%s7142_s2 + $0x18] sm:$0xff] (!%p457_p9)  ;;  %v530_v2 = vld [vmem:[%s7142_s2] sm:$0xff] (!%p457_p9)  ;;  %s7150_s4 = sld [smem:[#allocation16_spill]] (!%p457_p9)  ;;  %s7151_s5 = sld [smem:[#allocation17_spill]] (!%p457_p9) }
  0x20   : > { %v5652_v3 = vpack.c.bf16 (!%p457_p9), %v533_v1, %v531_v0  ;;  %v532_v4 = vld [vmem:[%s7142_s2 + $0x10] sm:$0xff] (!%p457_p9)  ;;  %v535_v5 = vld [vmem:[%s7142_s2 + $0x28] sm:$0xff] (!%p457_p9)  ;;  %v537_v6 = vld [vmem:[%s7142_s2 + $0x38] sm:$0xff] (!%p457_p9) }
  0x21   : > { %v5654_v8 = vpack.c.bf16 %v532_v4, %v530_v2  ;;  %v5656_v9 = vpack.c.bf16 %v537_v6, %v535_v5  ;;  %v534_v10 = vld [vmem:[%s7142_s2 + $0x20] sm:$0xff]  ;;  %v536_v11 = vld [vmem:[%s7142_s2 + $0x30] sm:$0xff]  ;;  %s517_s24 = scalar_select %p516_p10, %s6159_s22, 1 }
  0x22   : > { %5653 = vmatprep.subr.bf16.mxu0 %v5652_v3  ;;  %v5658_v12 = vpack.c.bf16 %v536_v11, %v534_v10 }
  0x23   : > { %5655 = vmatpush1.bf16.msra.mxu0 %v5654_v8  ;;  %s6214_s29 = sshll.u32 %s517_s24, 3  ;;  %s7126_s24 = smov 96  }
  0x24   : > { %5657 = vmatprep.subr.bf16.mxu0 %v5656_v9  ;;  %s519_s30 = scalar_lea.vmem %s7143_s0, %s6214_s29  ;;  %v540_v4 = vld [vmem:[%s7146_s3 + $0x10] sm:$0xff]  ;;  %v541_v5 = vld [vmem:[%s7146_s3 + $0x18] sm:$0xff]  ;;  %v538_v10 = vld [vmem:[%s7146_s3] sm:$0xff] }
  0x25   : > { %v6220_v13 = vld [vmem:[%s519_s30] sm:$0xff]  ;;  %v6312_v8 = vpack.c.bf16 %v541_v5, %v540_v4  ;;  %v539_v11 = vld [vmem:[%s7146_s3 + $0x8] sm:$0xff]  ;;  %s527_s30 = scalar_lea.vmem %s7111_s15, %s6214_s29 }
  0x27   : > { %5659 = vmatpush1.bf16.msra.mxu0 %v5658_v12  ;;  %v6327_v12 = vpack.c.bf16 %v539_v11, %v538_v10 }
  0x28   : > { %5285 = vmatprep.subr.mxu0 %v6044_v7 }
  0x2a   : > { %5018 = vmatmul.mubr.msk.f32.vlgmr.msra.gmra.mrb[0].mxu0 %vm650_vm0, %v6220_v13 }
  0x2b   : > { %727 = vmatprep.mubr.f32.mxu0 %v6044_v7 }
  0xfd   : > { %v723_v14 = vpop.f32.mrb[0].mxu0 }
  0xfe   : > { %813 = vrot.lane.b32.xlu1 %v723_v14, %s7128_s16  ;;  %735 = vrot.lane.b32.xlu0 %v723_v14, %s7120_s17  ;;  %v6230_v15 = vpop.f32.mrb[1].mxu0 }
 0x102   : > { %894 = vrot.lane.b32.xlu1 %v723_v14, %s7116_s23  ;;  %815 = vrot.lane.b32.xlu0 %v723_v14, %s7122_s20  ;;  %s523_s23 = scalar_lea.vmem %s7144_s1, %s6214_s29 }
 0x103   : > { %v6266_v39 = vld [vmem:[%s523_s23] sm:$0xff]  ;;  %s7145_s23 = smov 32  }
 0x104   : > { %5019 = vmatmul.mubr.msk.f32.gmra.mrb[2].mxu0 %vm650_vm0, %v6266_v39 }
 0x105   : > { %5287 = vmatprep.mubr.msk.f32.mxu0 %vm6045_vm1, %v6044_v7 }
 0x106   : > { %973 = vrot.lane.b32.xlu1 %v723_v14, %s7118_s27  ;;  %892 = vrot.lane.b32.xlu0 %v723_v14, %s7126_s24 }
 0x10a   : > { %971 = vrot.lane.b32.xlu0 %v723_v14, %s7124_s25 }
 0x170   : > { %v814_v16 = vpop.permute.xlu1 %813  ;;  %v736_v17 = vpop.permute.xlu0 %735 }
 0x171   : > { %5261 = vmatpush3.xpose.msk.msra.mxu1 %vm737_vm2, %v736_v17 }
 0x172   : > { %5265 = vmatprep.subr.mxu1 %v6044_v7 }
 0x174   : > { %5263 = vmatmul.mubr.msk.f32.vlgmr.msra.gmra.mrb[0].mxu1 %vm737_vm2, %v723_v14  ;;  %v816_v18 = vpop.permute.xlu0 %815  ;;  %v895_v19 = vpop.permute.xlu1 %894 }
 0x175   : > { %5266 = vmatpush3.xpose.msk.msra.mxu1 %vm737_vm2, %v816_v18  ;;  %5267 = vmatprep.mubr.msk.f32.mxu1 %vm6045_vm1, %v6044_v7 }
 0x176   : > { %5270 = vmatprep.subr.mxu1 %v6044_v7 }
 0x178   : > { %5268 = vmatmul.mubr.msk.f32.vlgmr.msra.gmra.mrb[2].mxu1 %vm737_vm2, %v814_v16  ;;  %v893_v20 = vpop.permute.xlu0 %892  ;;  %v974_v21 = vpop.permute.xlu1 %973 }
 0x179   : > { %5271 = vmatpush3.xpose.msk.msra.mxu1 %vm737_vm2, %v895_v19  ;;  %5272 = vmatprep.mubr.msk.f32.mxu1 %vm6045_vm1, %v6044_v7 }
 0x17a   : > { %5275 = vmatprep.subr.mxu1 %v6044_v7 }
 0x17c   : > { %5273 = vmatmul.mubr.msk.f32.vlgmr.msra.gmra.mrb[4].mxu1 %vm737_vm2, %v893_v20  ;;  %v972_v22 = vpop.permute.xlu0 %971 }
 0x17d   : > { %5276 = vmatpush3.xpose.msk.msra.mxu1 %vm737_vm2, %v974_v21  ;;  %5277 = vmatprep.mubr.msk.f32.mxu1 %vm6045_vm1, %v6044_v7 }
 0x17e   : > { %5280 = vmatprep.subr.mxu1 %v6044_v7 }
 0x180   : > { %5278 = vmatmul.mubr.msk.f32.vlgmr.msra.gmra.mrb[6].mxu1 %vm737_vm2, %v972_v22 }
 0x181   : > { %5281 = vmatpush3.msra.mxu1 %v6230_v15  ;;  %5282 = vmatprep.mubr.msk.f32.mxu1 %vm6045_vm1, %v6044_v7 }
 0x182   : > { %5660 = vmatprep.subr.bf16.mxu1 %v6053_v60 }
 0x1d7   : > { %v6286_v61 = vpop.f32.mrb[2].mxu0 }
 0x1d8   : > { %v6290_v62 = vpop.f32.mrb[3].mxu0 }
 0x247   : > { %v808_v23 = vpop.f32.mrb[0].mxu1 }
 0x248   : > { %v5264_v24 = vpop.f32.mrb[1].mxu1  ;;  %v812_v28 = vmul.f32 0.25, %v808_v23 }
 0x24a   : > { %v1051_v33 = vsel %vm1050_vm3, %v812_v28, -inf }
 0x24b   : > { %v887_v25 = vpop.f32.mrb[2].mxu1 }
 0x24c   : > { %v891_v26 = vmul.f32 0.25, %v887_v25  ;;  %v5269_v27 = vpop.f32.mrb[3].mxu1 }
 0x24e   : > { %v1054_v29 = vsel %vm1050_vm3, %v891_v26, -inf }
 0x24f   : > { %1055 = vmax.xlane.f32.xlu1 %v1054_v29  ;;  %v966_v30 = vpop.f32.mrb[4].mxu1 }
 0x250   : > { %v5274_v31 = vpop.f32.mrb[5].mxu1  ;;  %v970_v32 = vmul.f32 0.25, %v966_v30 }
 0x251   : > { %v542_v31 = vld [vmem:[%s7146_s3 + $0x20] sm:$0xff] }
 0x252   : > { %v1057_v37 = vsel %vm1050_vm3, %v970_v32, -inf }
 0x253   : > { %1052 = vmax.xlane.f32.xlu1 %v1051_v33  ;;  %v1045_v34 = vpop.f32.mrb[6].mxu1 }
 0x254   : > { %v5279_v35 = vpop.f32.mrb[7].mxu1  ;;  %v1049_v36 = vmul.f32 0.25, %v1045_v34  ;;  %v544_v34 = vld [vmem:[%s7146_s3 + $0x30] sm:$0xff] }
 0x255   : > { %v545_v35 = vld [vmem:[%s7146_s3 + $0x38] sm:$0xff] }
 0x256   : > { %v1060_v38 = vsel %vm1050_vm3, %v1049_v36, -inf }
 0x257   : > { %1058 = vmax.xlane.f32.xlu1 %v1057_v37 }
 0x25b   : > { %1061 = vmax.xlane.f32.xlu1 %v1060_v38  ;;  %v6377_v38 = vpack.c.bf16 %v545_v35, %v544_v34 }
 0x2dc   : > { %v1056_v40 = vpop.xlane.xlu1 %1055 }
 0x2dd   : > { %v1064_v41 = vsub.f32 %v891_v26, %v1056_v40 }
 0x2df   : > { %v1069_v42 = vmul.f32 1.442695, %v1064_v41 }
 0x2e0   : > { %v1053_v43 = vpop.xlane.xlu1 %1052 }
 0x2e1   : > { %5884 = vpow2.f32 %v1069_v42  ;;  %v1063_v44 = vsub.f32 %v812_v28, %v1053_v43 }
 0x2e3   : > { %v1067_v45 = vmul.f32 1.442695, %v1063_v44 }
 0x2e4   : > { %v1059_v46 = vpop.xlane.xlu1 %1058 }
 0x2e5   : > { %5886 = vpow2.f32 %v1067_v45  ;;  %v1065_v47 = vsub.f32 %v970_v32, %v1059_v46  ;;  %v543_v32 = vld [vmem:[%s7146_s3 + $0x28] sm:$0xff] }
 0x2e6   : > { %v6367_v33 = vpack.c.bf16 %v543_v32, %v542_v31 }
 0x2e7   : > { %v1071_v48 = vmul.f32 1.442695, %v1065_v47 }
 0x2e8   : > { %v1062_v49 = vpop.xlane.xlu1 %1061 }
 0x2e9   : > { %5888 = vpow2.f32 %v1071_v48  ;;  %v1066_v50 = vsub.f32 %v1049_v36, %v1062_v49 }
 0x2eb   : > { %v5885_v51 = vpop.eup %5884  ;;  %v1073_v52 = vmul.f32 1.442695, %v1066_v50 }
 0x2ec   : > { %v1078_v53 = vsel %vm1050_vm3, %v5885_v51, 0.0 }
 0x2ed   : > { %5890 = vpow2.f32 %v1073_v52  ;;  %1079 = vadd.xlane.f32.xlu0 %v1078_v53 }
 0x2ef   : > { %v5887_v54 = vpop.eup %5886 }
 0x2f0   : > { %v1075_v55 = vsel %vm1050_vm3, %v5887_v54, 0.0 }
 0x2f1   : > { %1076 = vadd.xlane.f32.xlu1 %v1075_v55 }
 0x2f3   : > { %v5889_v56 = vpop.eup %5888 }
 0x2f4   : > { %v1081_v57 = vsel %vm1050_vm3, %v5889_v56, 0.0 }
 0x2f5   : > { %1082 = vadd.xlane.f32.xlu1 %v1081_v57 }
 0x2f7   : > { %v6275_v58 = vpop.eup %5890 }
 0x2f8   : > { %v1084_v59 = vsel %vm1050_vm3, %v6275_v58, 0.0 }
 0x2f9   : > { %1085 = vadd.xlane.f32.xlu1 %v1084_v59 }
 0x303   : > { %1169 = vrot.lane.b32.xlu0 %v6230_v15, %s7128_s16 }
 0x307   : > { %1391 = vrot.lane.b32.xlu0 %v6230_v15, %s7126_s24 }
 0x30a   : > { %1541 = vrot.lane.b32.xlu1 %v6230_v15, %s7124_s25 }
 0x30b   : > { %1786 = vrot.lane.b32.xlu0 %v6286_v61, %s7122_s20  ;;  %s7148_s20 = smov 96  }
 0x30e   : > { %1944 = vrot.lane.b32.xlu1 %v6286_v61, %s7118_s27  ;;  %s6996_s27 = sand.u32 1, %s6034_s19  }
 0x30f   : > { %1784 = vrot.lane.b32.xlu0 %v6286_v61, %s7128_s16  ;;  %s7147_s16 = smov 112  }
 0x313   : > { %1707 = vrot.lane.b32.xlu0 %v6286_v61, %s7120_s17  ;;  %s7154_s17 = smov 16  }
 0x317   : > { %1865 = vrot.lane.b32.xlu0 %v6286_v61, %s7145_s23 }
 0x31b   : > { %1863 = vrot.lane.b32.xlu0 %v6286_v61, %s7126_s24  ;;  %s7149_s24 = smov 80  }
 0x31f   : > { %1942 = vrot.lane.b32.xlu0 %v6286_v61, %s7124_s25 }
 0x37a   : > { %v1080_v63 = vpop.xlane.xlu0 %1079 }
 0x37b   : > { %5892 = vrcp.f32 %v1080_v63 }
 0x37e   : > { %v1077_v0 = vpop.xlane.xlu1 %1076  ;;  %v1170_v1 = vpop.permute.xlu0 %1169 }
 0x37f   : > { %5894 = vrcp.f32 %v1077_v0  ;;  %5286 = vmatpush3.msra.mxu0 %v1170_v1 }
 0x380   : > { %5663 = vmatprep.subr.bf16.mxu0 %v6053_v60 }
 0x382   : > { %v1083_v14 = vpop.xlane.xlu1 %1082  ;;  %v1392_v15 = vpop.permute.xlu0 %1391 }
 0x383   : > { %5896 = vrcp.f32 %v1083_v14 }
 0x385   : > { %v5893_v2 = vpop.eup %5892 }
 0x386   : > { %v1092_v3 = vmul.f32 %v5893_v2, %v5885_v51  ;;  %v1086_v16 = vpop.xlane.xlu1 %1085  ;;  %v1787_v17 = vpop.permute.xlu0 %1786 }
 0x387   : > { %5898 = vrcp.f32 %v1086_v16 }
 0x388   : > { %5288 = vmatmul.mubr.msk.f32.vlgmr.msra.gmra.mrb[4].mxu0 %vm1050_vm3, %v1092_v3 }
 0x389   : > { %v5895_v6 = vpop.eup %5894  ;;  %5301 = vmatprep.mubr.msk.f32.mxu0 %vm6045_vm1, %v6044_v7  ;;  %5665 = vmatpush3.bf16.msra.mxu0 %v6327_v12 }
 0x38a   : > { %v1091_v9 = vmul.f32 %v5895_v6, %v5887_v54  ;;  %5666 = vmatprep.subr.bf16.mxu0 %v6053_v60  ;;  %v6331_v18 = vpop.permute.xlu0 %1784  ;;  %v1542_v24 = vpop.permute.xlu1 %1541 }
 0x38c   : > { %5283 = vmatmul.mubr.msk.f32.vlgmr.msra.gmra.mrb[8].mxu1 %vm1050_vm3, %v1091_v9 }
 0x38d   : > { %5662 = vmatpush3.bf16.msra.mxu1 %v6312_v8  ;;  %5294 = vmatprep.mubr.msk.f32.mxu1 %vm6045_vm1, %v6044_v7  ;;  %v5897_v19 = vpop.eup %5896 }
 0x38e   : > { %5304 = vmatprep.subr.mxu1 %v6044_v7  ;;  %v1093_v22 = vmul.f32 %v5897_v19, %v5889_v56  ;;  %v1708_v27 = vpop.permute.xlu0 %1707  ;;  %v1945_v49 = vpop.permute.xlu1 %1944 }
 0x391   : > { %v5899_v23 = vpop.eup %5898 }
 0x392   : > { %v1094_v28 = vmul.f32 %v5899_v23, %v6275_v58  ;;  %v1866_v29 = vpop.permute.xlu0 %1865 }
 0x396   : > { %v1864_v30 = vpop.permute.xlu0 %1863 }
 0x39a   : > { %v1943_v52 = vpop.permute.xlu0 %1942 }
 0x45b   : > { %v1241_v20 = vpop.f32.mrb[4].mxu0 }
 0x45c   : > { %v5289_v21 = vpop.f32.mrb[5].mxu0  ;;  %5295 = vmatmul.mubr.msk.f32.vlgmr.msra.gmra.mrb[10].mxu1 %vm737_vm2, %v1241_v20 }
 0x45d   : > { %5305 = vmatpush3.msra.mxu1 %v1392_v15  ;;  %5306 = vmatprep.mubr.msk.f32.mxu1 %vm6045_vm1, %v6044_v7 }
 0x45e   : > { %5316 = vmatprep.subr.mxu1 %v6044_v7 }
 0x45f   : > { %v1164_v25 = vpop.f32.mrb[8].mxu1 }
 0x460   : > { %v5284_v26 = vpop.f32.mrb[9].mxu1  ;;  %5302 = vmatmul.mubr.msk.f32.vlgmr.msra.gmra.mrb[6].mxu0 %vm737_vm2, %v1164_v25  ;;  %5307 = vmatmul.mubr.msk.f32.vlgmr.msra.gmra.mrb[12].mxu1 %vm1050_vm3, %v1093_v22 }
 0x461   : > { %5317 = vmatpush3.msra.mxu1 %v1542_v24  ;;  %5318 = vmatprep.mubr.msk.f32.mxu1 %vm6045_vm1, %v6044_v7 }
 0x462   : > { %5328 = vmatprep.subr.mxu1 %v6044_v7  ;;  %5313 = vmatprep.mubr.msk.f32.mxu0 %vm6045_vm1, %v6044_v7 }
 0x463   : > { %5668 = vmatpush3.bf16.msra.mxu0 %v6367_v33 }
 0x464   : > { %5319 = vmatmul.mubr.msk.f32.vlgmr.msra.gmra.mrb[14].mxu1 %vm1050_vm3, %v1094_v28  ;;  %5669 = vmatprep.subr.bf16.mxu0 %v6053_v60 }
 0x465   : > { %5330 = vmatprep.mubr.msk.f32.mxu1 %vm6045_vm1, %v6044_v7 }
 0x468   : > { %5329 = vmatpush3.xpose.msk.msra.mxu1 %vm737_vm2, %v1708_v27 }
 0x469   : > { %5338 = vmatprep.subr.mxu1 %v6044_v7 }
 0x46b   : > { %5331 = vmatmul.mubr.msk.f32.vlgmr.msra.gmra.mrb[16].mxu1 %vm737_vm2, %v6286_v61 }
 0x46c   : > { %5339 = vmatpush3.xpose.msk.msra.mxu1 %vm737_vm2, %v1866_v29  ;;  %5340 = vmatprep.mubr.msk.f32.mxu1 %vm6045_vm1, %v6044_v7 }
 0x46d   : > { %5348 = vmatprep.subr.mxu1 %v6044_v7 }
 0x46f   : > { %5341 = vmatmul.mubr.msk.f32.vlgmr.msra.gmra.mrb[18].mxu1 %vm737_vm2, %v1864_v30 }
 0x470   : > { %5349 = vmatpush3.msra.mxu1 %v6290_v62  ;;  %5350 = vmatprep.mubr.msk.f32.mxu1 %vm6045_vm1, %v6044_v7 }
 0x471   : > { %5672 = vmatprep.subr.bf16.mxu1 %v6053_v60 }
 0x52f   : > { %v1314_v36 = vpop.f32.mrb[10].mxu1 }
 0x530   : > { %v5296_v37 = vpop.f32.mrb[11].mxu1 }
 0x533   : > { %v1387_v40 = vpop.f32.mrb[6].mxu0  ;;  %v1463_v41 = vpop.f32.mrb[12].mxu1 }
 0x534   : > { %v1388_v42 = vadd.f32 %v1387_v40, %v1314_v36  ;;  %v5303_v43 = vpop.f32.mrb[7].mxu0  ;;  %v5308_v44 = vpop.f32.mrb[13].mxu1  ;;  %5314 = vmatmul.mubr.msk.f32.vlgmr.msra.gmra.mrb[8].mxu0 %vm737_vm2, %v1463_v41 }
 0x535   : > { %5671 = vmatpush3.bf16.msra.mxu0 %v6377_v38  ;;  %5325 = vmatprep.mubr.msk.f32.mxu0 %vm6045_vm1, %v6044_v7 }
 0x536   : > { %5333 = vmatprep.subr.mxu0 %v6044_v7 }
 0x537   : > { %v1613_v45 = vpop.f32.mrb[14].mxu1 }
 0x538   : > { %v5320_v46 = vpop.f32.mrb[15].mxu1  ;;  %5326 = vmatmul.mubr.msk.f32.vlgmr.msra.gmra.mrb[10].mxu0 %vm737_vm2, %v1613_v45 }
 0x539   : > { %5335 = vmatprep.mubr.msk.f32.mxu0 %vm6045_vm1, %v6044_v7 }
 0x53e   : > { %v1779_v47 = vpop.f32.mrb[16].mxu1  ;;  %5334 = vmatpush3.xpose.msk.msra.mxu0 %vm737_vm2, %v1787_v17 }
 0x53f   : > { %v5332_v48 = vpop.f32.mrb[17].mxu1  ;;  %5343 = vmatprep.subr.mxu0 %v6044_v7  ;;  %v1783_v0 = vmul.f32 0.25, %v1779_v47 }
 0x541   : > { %5336 = vmatmul.mubr.msk.f32.vlgmr.msra.gmra.mrb[12].mxu0 %vm737_vm2, %v6331_v18  ;;  %v2021_v5 = vsel %vm1050_vm3, %v1783_v0, -inf }
 0x542   : > { %5344 = vmatpush3.xpose.msk.msra.mxu0 %vm737_vm2, %v1945_v49  ;;  %5345 = vmatprep.mubr.msk.f32.mxu0 %vm6045_vm1, %v6044_v7  ;;  %v1937_v50 = vpop.f32.mrb[18].mxu1 }
 0x543   : > { %v5342_v51 = vpop.f32.mrb[19].mxu1  ;;  %5353 = vmatprep.subr.mxu0 %v6044_v7  ;;  %v1941_v4 = vmul.f32 0.25, %v1937_v50 }
 0x545   : > { %5346 = vmatmul.mubr.msk.f32.vlgmr.msra.gmra.mrb[14].mxu0 %vm737_vm2, %v1943_v52  ;;  %v2027_v9 = vsel %vm1050_vm3, %v1941_v4, -inf }
 0x546   : > { %5355 = vmatprep.mubr.msk.f32.mxu0 %vm6045_vm1, %v6044_v7 }
 0x607   : > { %v1536_v53 = vpop.f32.mrb[8].mxu0 }
 0x608   : > { %v1540_v54 = vadd.f32 %v1536_v53, %v1388_v42  ;;  %v5315_v55 = vpop.f32.mrb[9].mxu0 }
 0x609   : > { %v549_v55 = vld [vmem:[%s7150_s4 + $0x18] sm:$0xff] }
 0x60b   : > { %v1686_v56 = vpop.f32.mrb[10].mxu0 }
 0x60c   : > { %v1690_v57 = vadd.f32 %v1686_v56, %v1540_v54  ;;  %v5327_v58 = vpop.f32.mrb[11].mxu0  ;;  %v547_v54 = vld [vmem:[%s7150_s4 + $0x8] sm:$0xff] }
 0x60d   : > { %v5684_v58 = vpack.c.bf16 %v549_v55, %v547_v54 }
 0x60e   : > { %v1691_v34 = vadd.f32 %v1690_v57, %v6220_v13 }
 0x610   : > { %v1692_v35 = vsel %vm650_vm0, %v1691_v34, 0.0 }
 0x614   : > { %v1858_v59 = vpop.f32.mrb[12].mxu0 }
 0x615   : > { %v1862_v61 = vmul.f32 0.25, %v1858_v59  ;;  %v5337_v63 = vpop.f32.mrb[13].mxu0  ;;  %v546_v59 = vld [vmem:[%s7150_s4] sm:$0xff] }
 0x617   : > { %v2024_v1 = vsel %vm1050_vm3, %v1862_v61, -inf }
 0x618   : > { %2025 = vmax.xlane.f32.xlu1 %v2024_v1  ;;  %v2016_v2 = vpop.f32.mrb[14].mxu0  ;;  %v551_v1 = vld [vmem:[%s7150_s4 + $0x28] sm:$0xff] }
 0x619   : > { %v5347_v3 = vpop.f32.mrb[15].mxu0  ;;  %v2020_v6 = vmul.f32 0.25, %v2016_v2  ;;  %v553_v2 = vld [vmem:[%s7150_s4 + $0x38] sm:$0xff] }
 0x61b   : > { %v2030_v10 = vsel %vm1050_vm3, %v2020_v6, -inf }
 0x61c   : > { %2022 = vmax.xlane.f32.xlu1 %v2021_v5 }
 0x620   : > { %2028 = vmax.xlane.f32.xlu1 %v2027_v9  ;;  %v5688_v9 = vpack.c.bf16 %v553_v2, %v551_v1 }
 0x624   : > { %2031 = vmax.xlane.f32.xlu1 %v2030_v10  ;;  %v550_v10 = vld [vmem:[%s7150_s4 + $0x20] sm:$0xff] }
 0x6a5   : > { %v2026_v11 = vpop.xlane.xlu1 %2025 }
 0x6a6   : > { %v2034_v14 = vsub.f32 %v1862_v61, %v2026_v11  ;;  %v548_v61 = vld [vmem:[%s7150_s4 + $0x10] sm:$0xff] }
 0x6a7   : > { %v5686_v5 = vpack.c.bf16 %v548_v61, %v546_v59  ;;  %v552_v11 = vld [vmem:[%s7150_s4 + $0x30] sm:$0xff]  ;;  %s7152_s4 = smov 48  }
 0x6a8   : > { %v2039_v15 = vmul.f32 1.442695, %v2034_v14  ;;  %v5690_v14 = vpack.c.bf16 %v552_v11, %v550_v10  ;;  %v573_v10 = vld [vmem:[%s7102_s6 + $0x18] sm:$0xff] }
 0x6a9   : > { %v2023_v16 = vpop.xlane.xlu1 %2022 }
 0x6aa   : > { %5900 = vpow2.f32 %v2039_v15  ;;  %v2033_v17 = vsub.f32 %v1783_v0, %v2023_v16 }
 0x6ac   : > { %v2037_v18 = vmul.f32 1.442695, %v2033_v17 }
 0x6ad   : > { %v2029_v19 = vpop.xlane.xlu1 %2028 }
 0x6ae   : > { %5902 = vpow2.f32 %v2037_v18  ;;  %v2035_v20 = vsub.f32 %v1941_v4, %v2029_v19  ;;  %v554_v18 = vld [vmem:[%s7151_s5] sm:$0xff]  ;;  %v555_v19 = vld [vmem:[%s7151_s5 + $0x8] sm:$0xff] }
 0x6b0   : > { %v2041_v21 = vmul.f32 1.442695, %v2035_v20 }
 0x6b1   : > { %v2032_v22 = vpop.xlane.xlu1 %2031 }
 0x6b2   : > { %5904 = vpow2.f32 %v2041_v21  ;;  %v2036_v23 = vsub.f32 %v2020_v6, %v2032_v22 }
 0x6b4   : > { %v5901_v24 = vpop.eup %5900  ;;  %v2043_v25 = vmul.f32 1.442695, %v2036_v23 }
 0x6b5   : > { %v2048_v26 = vsel %vm1050_vm3, %v5901_v24, 0.0 }
 0x6b6   : > { %5906 = vpow2.f32 %v2043_v25  ;;  %2049 = vadd.xlane.f32.xlu0 %v2048_v26  ;;  %v5693_v25 = vpack.c.bf16 %v555_v19, %v554_v18  ;;  %v556_v26 = vld [vmem:[%s7151_s5 + $0x10] sm:$0xff]  ;;  %v578_v19 = vld [vmem:[%s7102_s6 + $0x40] sm:$0xff] }
 0x6b8   : > { %v5903_v27 = vpop.eup %5902 }
 0x6b9   : > { %v2045_v28 = vsel %vm1050_vm3, %v5903_v27, 0.0 }
 0x6ba   : > { %2046 = vadd.xlane.f32.xlu1 %v2045_v28 }
 0x6bc   : > { %v5905_v29 = vpop.eup %5904 }
 0x6bd   : > { %v2051_v30 = vsel %vm1050_vm3, %v5905_v29, 0.0 }
 0x6be   : > { %2052 = vadd.xlane.f32.xlu1 %v2051_v30  ;;  %v558_v30 = vld [vmem:[%s7151_s5 + $0x20] sm:$0xff] }
 0x6c0   : > { %v6405_v31 = vpop.eup %5906 }
 0x6c1   : > { %v2054_v32 = vsel %vm1050_vm3, %v6405_v31, 0.0 }
 0x6c2   : > { %2055 = vadd.xlane.f32.xlu1 %v2054_v32 }
 0x6cc   : > { %2139 = vrot.lane.b32.xlu0 %v6290_v62, %s7147_s16 }
 0x6d0   : > { %2361 = vrot.lane.b32.xlu0 %v6290_v62, %s7148_s20 }
 0x6d3   : > { %2511 = vrot.lane.b32.xlu1 %v6290_v62, %s7149_s24 }
 0x6ef   : > { %1693 = vadd.xlane.f32.xlu0 %v1692_v35  ;;  %v561_v35 = vld [vmem:[%s7151_s5 + $0x38] sm:$0xff] }
 0x743   : > { %v2050_v36 = vpop.xlane.xlu0 %2049 }
 0x744   : > { %5908 = vrcp.f32 %v2050_v36 }
 0x747   : > { %v2140_v37 = vpop.permute.xlu0 %2139  ;;  %v2047_v40 = vpop.xlane.xlu1 %2046 }
 0x748   : > { %5910 = vrcp.f32 %v2047_v40  ;;  %5354 = vmatpush3.msra.mxu0 %v2140_v37 }
 0x749   : > { %5675 = vmatprep.subr.bf16.mxu0 %v6053_v60 }
 0x74b   : > { %v2362_v62 = vpop.permute.xlu0 %2361  ;;  %v2053_v48 = vpop.xlane.xlu1 %2052 }
 0x74c   : > { %5912 = vrcp.f32 %v2053_v48  ;;  %v569_v48 = vld [vmem:[%s7151_s5 + $0x78] sm:$0xff] }
 0x74e   : > { %v5909_v41 = vpop.eup %5908 }
 0x74f   : > { %v2062_v42 = vmul.f32 %v5909_v41, %v5901_v24  ;;  %v2056_v49 = vpop.xlane.xlu1 %2055  ;;  %v562_v41 = vld [vmem:[%s7151_s5 + $0x40] sm:$0xff] }
 0x750   : > { %5914 = vrcp.f32 %v2056_v49 }
 0x751   : > { %5356 = vmatmul.mubr.msk.f32.vlgmr.msra.gmra.mrb[16].mxu0 %vm1050_vm3, %v2062_v42  ;;  %v563_v42 = vld [vmem:[%s7151_s5 + $0x48] sm:$0xff] }
 0x752   : > { %v5911_v43 = vpop.eup %5910  ;;  %5677 = vmatpush3.bf16.msra.mxu0 %v6327_v12  ;;  %5369 = vmatprep.mubr.msk.f32.mxu0 %vm6045_vm1, %v6044_v7 }
 0x753   : > { %v2061_v13 = vmul.f32 %v5911_v43, %v5903_v27  ;;  %5678 = vmatprep.subr.bf16.mxu0 %v6053_v60  ;;  %v2512_v3 = vpop.permute.xlu1 %2511  ;;  %v557_v27 = vld [vmem:[%s7151_s5 + $0x18] sm:$0xff]  ;;  %v5705_v43 = vpack.c.bf16 %v563_v42, %v562_v41 }
 0x755   : > { %5351 = vmatmul.mubr.msk.f32.vlgmr.msra.gmra.mrb[20].mxu1 %vm1050_vm3, %v2061_v13  ;;  %v564_v13 = vld [vmem:[%s7151_s5 + $0x50] sm:$0xff] }
 0x756   : > { %5674 = vmatpush3.bf16.msra.mxu1 %v6312_v8  ;;  %5362 = vmatprep.mubr.msk.f32.mxu1 %vm6045_vm1, %v6044_v7  ;;  %v5913_v52 = vpop.eup %5912 }
 0x757   : > { %5372 = vmatprep.subr.mxu1 %v6044_v7  ;;  %v2063_v57 = vmul.f32 %v5913_v52, %v5905_v29 }
 0x75a   : > { %v5915_v63 = vpop.eup %5914 }
 0x75b   : > { %v2064_v6 = vmul.f32 %v5915_v63, %v6405_v31  ;;  %v559_v31 = vld [vmem:[%s7151_s5 + $0x28] sm:$0xff] }
 0x75c   : > { %v5699_v32 = vpack.c.bf16 %v559_v31, %v558_v30 }
 0x77c   : > { %v1694_v44 = vpop.xlane.xlu0 %1693 }
 0x77d   : > { %v1696_v45 = vmul.f32 0.03125, %v1694_v44 }
 0x77f   : > { %v1697_v46 = vsub.f32 %v1691_v34, %v1696_v45  ;;  %v560_v34 = vld [vmem:[%s7151_s5 + $0x30] sm:$0xff]  ;;  %v566_v45 = vld [vmem:[%s7151_s5 + $0x60] sm:$0xff] }
 0x780   : > { %v5702_v40 = vpack.c.bf16 %v561_v35, %v560_v34  ;;  %v585_v34 = vld [vmem:[%s7102_s6 + $0x78] sm:$0xff] }
 0x781   : > { %v1698_v12 = vmul.f32 %v1697_v46, %v1697_v46 }
 0x783   : > { %v1699_v47 = vsel %vm650_vm0, %v1698_v12, 0.0 }
 0x784   : > { %1700 = vadd.xlane.f32.xlu0 %v1699_v47  ;;  %v568_v47 = vld [vmem:[%s7151_s5 + $0x70] sm:$0xff] }
 0x785   : > { %v5714_v49 = vpack.c.bf16 %v569_v48, %v568_v47  ;;  %v587_v47 = vld [vmem:[%s7103_s7 + $0x8] sm:$0xff]  ;;  %v589_v48 = vld [vmem:[%s7103_s7 + $0x18] sm:$0xff] }
 0x811   : > { %v1701_v50 = vpop.xlane.xlu0 %1700 }
 0x812   : > { %v1702_v51 = vmul.f32 0.03125, %v1701_v50 }
 0x814   : > { %v1703_v8 = vadd.f32 1e-05, %v1702_v51 }
 0x816   : > { %5916 = vrsqrt.f32 %v1703_v8 }
 0x820   : > { %v5917_v15 = vpop.eup %5916 }
 0x821   : > { %v6468_v16 = vmul.f32 %v5917_v15, %v1697_v46  ;;  %v567_v46 = vld [vmem:[%s7151_s5 + $0x68] sm:$0xff] }
 0x822   : > { %v5711_v12 = vpack.c.bf16 %v567_v46, %v566_v45  ;;  %v575_v15 = vld [vmem:[%s7102_s6 + $0x28] sm:$0xff] }
 0x824   : > { %v2211_v53 = vpop.f32.mrb[16].mxu0 }
 0x825   : > { %v5357_v56 = vpop.f32.mrb[17].mxu0  ;;  %5363 = vmatmul.mubr.msk.f32.vlgmr.msra.gmra.mrb[22].mxu1 %vm737_vm2, %v2211_v53 }
 0x826   : > { %5373 = vmatpush3.msra.mxu1 %v2362_v62  ;;  %5374 = vmatprep.mubr.msk.f32.mxu1 %vm6045_vm1, %v6044_v7  ;;  %v565_v62 = vld [vmem:[%s7151_s5 + $0x58] sm:$0xff]  ;;  %s7153_s5 = smov 64  }
 0x827   : > { %5384 = vmatprep.subr.mxu1 %v6044_v7  ;;  %v5708_v44 = vpack.c.bf16 %v565_v62, %v564_v13 }
 0x828   : > { %v2134_v0 = vpop.f32.mrb[20].mxu1 }
 0x829   : > { %v5352_v4 = vpop.f32.mrb[21].mxu1  ;;  %5370 = vmatmul.mubr.msk.f32.vlgmr.msra.gmra.mrb[18].mxu0 %vm737_vm2, %v2134_v0  ;;  %5375 = vmatmul.mubr.msk.f32.vlgmr.msra.gmra.mrb[24].mxu1 %vm1050_vm3, %v2063_v57 }
 0x82a   : > { %5385 = vmatpush3.msra.mxu1 %v2512_v3  ;;  %5386 = vmatprep.mubr.msk.f32.mxu1 %vm6045_vm1, %v6044_v7 }
 0x82b   : > { %5685 = vmatprep.subr.bf16.mxu1 %v5684_v58  ;;  %5680 = vmatpush3.bf16.msra.mxu0 %v6367_v33 }
 0x82c   : > { %5381 = vmatprep.mubr.msk.f32.mxu0 %vm6045_vm1, %v6044_v7  ;;  %5681 = vmatprep.subr.bf16.mxu0 %v6053_v60 }
 0x82d   : > { %5387 = vmatmul.mubr.msk.f32.vlgmr.msra.gmra.mrb[26].mxu1 %vm1050_vm3, %v2064_v6  ;;  %v572_v6 = vld [vmem:[%s7102_s6 + $0x10] sm:$0xff] }
 0x82e   : > { %5687 = vmatpush1.bf16.msra.mxu1 %v5686_v5  ;;  %2745 = vmatprep.mubr.f32.mxu1 %v6044_v7  ;;  %v571_v5 = vld [vmem:[%s7102_s6 + $0x8] sm:$0xff]  ;;  %v5720_v11 = vpack.c.bf16 %v573_v10, %v572_v6 }
 0x82f   : > { %5689 = vmatprep.subr.bf16.mxu1 %v5688_v9 }
 0x832   : > { %5691 = vmatpush1.bf16.msra.mxu1 %v5690_v14  ;;  %v574_v14 = vld [vmem:[%s7102_s6 + $0x20] sm:$0xff] }
 0x833   : > { %5716 = vmatprep.subr.bf16.mxu1 %v6053_v60 }
 0x835   : > { %5052 = vmatmul.mubr.msk.f32.vlgmr.msra.gmra.mrb[28].mxu1 %vm650_vm0, %v6468_v16 }
 0x836   : > { %2750 = vmatprep.mubr.f32.mxu1 %v6044_v7 }
 0x8f8   : > { %v2284_v33 = vpop.f32.mrb[22].mxu1 }
 0x8f9   : > { %v5364_v17 = vpop.f32.mrb[23].mxu1 }
 0x8fa   : > { %v577_v17 = vld [vmem:[%s7102_s6 + $0x38] sm:$0xff] }
 0x8fc   : > { %v2357_v20 = vpop.f32.mrb[18].mxu0  ;;  %v2433_v21 = vpop.f32.mrb[24].mxu1 }
 0x8fd   : > { %v2358_v22 = vadd.f32 %v2357_v20, %v2284_v33  ;;  %v5371_v23 = vpop.f32.mrb[19].mxu0  ;;  %v5376_v24 = vpop.f32.mrb[25].mxu1  ;;  %5382 = vmatmul.mubr.msk.f32.vlgmr.msra.gmra.mrb[20].mxu0 %vm737_vm2, %v2433_v21  ;;  %v576_v33 = vld [vmem:[%s7102_s6 + $0x30] sm:$0xff]  ;;  %v579_v20 = vld [vmem:[%s7102_s6 + $0x48] sm:$0xff] }
 0x8fe   : > { %5683 = vmatpush3.bf16.msra.mxu0 %v6377_v38  ;;  %5393 = vmatprep.mubr.msk.f32.mxu0 %vm6045_vm1, %v6044_v7  ;;  %v5696_v38 = vpack.c.bf16 %v557_v27, %v556_v26  ;;  %v5726_v18 = vpack.c.bf16 %v577_v17, %v576_v33  ;;  %v5729_v21 = vpack.c.bf16 %v579_v20, %v578_v19  ;;  %v581_v23 = vld [vmem:[%s7102_s6 + $0x58] sm:$0xff]  ;;  %v583_v26 = vld [vmem:[%s7102_s6 + $0x68] sm:$0xff] }
 0x8ff   : > { %5692 = vmatprep.subr.bf16.mxu0 %v6053_v60 }
 0x900   : > { %v2583_v28 = vpop.f32.mrb[26].mxu1 }
 0x901   : > { %v5388_v29 = vpop.f32.mrb[27].mxu1  ;;  %5394 = vmatmul.mubr.msk.f32.vlgmr.msra.gmra.mrb[22].mxu0 %vm737_vm2, %v2583_v28 }
 0x902   : > { %5694 = vmatpush3.bf16.msra.mxu0 %v5693_v25  ;;  %5428 = vmatprep.mubr.msk.f32.mxu0 %vm6045_vm1, %v6044_v7  ;;  %v582_v25 = vld [vmem:[%s7102_s6 + $0x60] sm:$0xff] }
 0x903   : > { %5695 = vmatprep.subr.bf16.mxu0 %v6053_v60  ;;  %v5735_v27 = vpack.c.bf16 %v583_v26, %v582_v25 }
 0x906   : > { %5697 = vmatpush3.bf16.msra.mxu0 %v5696_v38 }
 0x907   : > { %5698 = vmatprep.subr.bf16.mxu0 %v6053_v60 }
 0x908   : > { %v2747_v36 = vpop.f32.mrb[28].mxu1 }
 0x909   : > { %v2749_v37 = vpop.f32.mrb[29].mxu1  ;;  %v2756_v50 = vmax.f32 %v2747_v36, 0.0 }
 0x90a   : > { %5700 = vmatpush3.bf16.msra.mxu0 %v5699_v32  ;;  %v584_v32 = vld [vmem:[%s7102_s6 + $0x70] sm:$0xff] }
 0x90b   : > { %5701 = vmatprep.subr.bf16.mxu0 %v6053_v60  ;;  %v5738_v35 = vpack.c.bf16 %v585_v34, %v584_v32 }
 0x90e   : > { %5703 = vmatpush3.bf16.msra.mxu0 %v5702_v40 }
 0x90f   : > { %5704 = vmatprep.subr.bf16.mxu0 %v6053_v60 }
 0x912   : > { %5706 = vmatpush3.bf16.msra.mxu0 %v5705_v43 }
 0x913   : > { %5707 = vmatprep.subr.bf16.mxu0 %v6053_v60 }
 0x916   : > { %5709 = vmatpush3.bf16.msra.mxu0 %v5708_v44 }
 0x917   : > { %5710 = vmatprep.subr.bf16.mxu0 %v6053_v60 }
 0x91a   : > { %5712 = vmatpush3.bf16.msra.mxu0 %v5711_v12 }
 0x91b   : > { %5713 = vmatprep.subr.bf16.mxu0 %v6053_v60 }
 0x91e   : > { %5715 = vmatpush3.bf16.msra.mxu0 %v5714_v49  ;;  %v586_v49 = vld [vmem:[%s7103_s7] sm:$0xff] }
 0x921   : > { %5429 = vmatmul.mubr.f32.vlgmr.msra.gmra.mrb[24].mxu0 %v2756_v50  ;;  %v5740_v50 = vpack.c.bf16 %v589_v48, %v587_v47 }
 0x922   : > { %2994 = vmatprep.mubr.f32.mxu0 %v6044_v7 }
 0x923   : > { %5741 = vmatprep.subr.bf16.mxu0 %v5740_v50 }
 0x9d0   : > { %v2506_v51 = vpop.f32.mrb[20].mxu0 }
 0x9d1   : > { %v2510_v8 = vadd.f32 %v2506_v51, %v2358_v22  ;;  %v5383_v52 = vpop.f32.mrb[21].mxu0  ;;  %v580_v22 = vld [vmem:[%s7102_s6 + $0x50] sm:$0xff] }
 0x9d2   : > { %v5732_v24 = vpack.c.bf16 %v581_v23, %v580_v22  ;;  %v588_v51 = vld [vmem:[%s7103_s7 + $0x10] sm:$0xff]  ;;  %v593_v52 = vld [vmem:[%s7103_s7 + $0x38] sm:$0xff] }
 0x9d4   : > { %v2656_v53 = vpop.f32.mrb[22].mxu0 }
 0x9d5   : > { %v2660_v54 = vadd.f32 %v2656_v53, %v2510_v8  ;;  %v5395_v55 = vpop.f32.mrb[23].mxu0  ;;  %v591_v8 = vld [vmem:[%s7103_s7 + $0x28] sm:$0xff]  ;;  %v5742_v53 = vpack.c.bf16 %v588_v51, %v586_v49 }
 0x9d6   : > { %v590_v55 = vld [vmem:[%s7103_s7 + $0x20] sm:$0xff] }
 0x9d7   : > { %v2661_v56 = vadd.f32 %v2660_v54, %v6266_v39  ;;  %v570_v39 = vld [vmem:[%s7102_s6] sm:$0xff]  ;;  %v5744_v54 = vpack.c.bf16 %v593_v52, %v591_v8  ;;  %5743 = vmatpush1.bf16.msra.mxu0 %v5742_v53 }
 0x9d8   : > { %v5717_v9 = vpack.c.bf16 %v571_v5, %v570_v39 }
 0x9d9   : > { %v2662_v57 = vsel %vm650_vm0, %v2661_v56, 0.0  ;;  %5745 = vmatprep.subr.bf16.mxu0 %v5744_v54 }
 0x9da   : > { %2663 = vadd.xlane.f32.xlu1 %v2662_v57  ;;  %5718 = vmatpush3.bf16.msra.mxu1 %v5717_v9 }
 0x9db   : > { %5719 = vmatprep.subr.bf16.mxu1 %v6053_v60 }
 0x9de   : > { %5721 = vmatpush3.bf16.msra.mxu1 %v5720_v11 }
 0x9df   : > { %5722 = vmatprep.subr.bf16.mxu1 %v6053_v60 }
 0x9f4   : > { %v2824_v58 = vpop.f32.mrb[24].mxu0 }
 0x9f5   : > { %v5430_v59 = vpop.f32.mrb[25].mxu0  ;;  %v2825_v2 = vadd.f32 %v2824_v58, %v6468_v16  ;;  %v5723_v16 = vpack.c.bf16 %v575_v15, %v574_v14 }
 0x9f7   : > { %v2828_v4 = vsel %vm650_vm0, %v2825_v2, 0.0  ;;  %5724 = vmatpush3.bf16.msra.mxu1 %v5723_v16 }
 0x9f8   : > { %5725 = vmatprep.subr.bf16.mxu1 %v6053_v60 }
 0x9fb   : > { %5727 = vmatpush3.bf16.msra.mxu1 %v5726_v18 }
 0x9fc   : > { %5728 = vmatprep.subr.bf16.mxu1 %v6053_v60 }
 0x9ff   : > { %5730 = vmatpush3.bf16.msra.mxu1 %v5729_v21 }
 0xa00   : > { %5731 = vmatprep.subr.bf16.mxu1 %v6053_v60 }
 0xa03   : > { %5733 = vmatpush3.bf16.msra.mxu1 %v5732_v24 }
 0xa04   : > { %5734 = vmatprep.subr.bf16.mxu1 %v6053_v60 }
 0xa07   : > { %5736 = vmatpush3.bf16.msra.mxu1 %v5735_v27 }
 0xa08   : > { %5737 = vmatprep.subr.bf16.mxu1 %v6053_v60 }
 0xa0b   : > { %5739 = vmatpush3.bf16.msra.mxu1 %v5738_v35 }
 0xa0c   : > { %5466 = vmatprep.subr.mxu1 %v6044_v7 }
 0xa67   : > { %v2664_v61 = vpop.xlane.xlu1 %2663 }
 0xa68   : > { %v2665_v63 = vmul.f32 0.03125, %v2664_v61 }
 0xa6a   : > { %v2666_v0 = vsub.f32 %v2661_v56, %v2665_v63  ;;  %v592_v56 = vld [vmem:[%s7103_s7 + $0x30] sm:$0xff] }
 0xa6b   : > { %v5746_v57 = vpack.c.bf16 %v592_v56, %v590_v55 }
 0xa6c   : > { %v2667_v1 = vmul.f32 %v2666_v0, %v2666_v0 }
 0xa6d   : > { %5747 = vmatpush1.bf16.msra.mxu0 %v5746_v57 }
 0xa6e   : > { %v2668_v3 = vsel %vm650_vm0, %v2667_v1, 0.0  ;;  %5476 = vmatprep.subr.mxu0 %v6044_v7 }
 0xa6f   : > { %2669 = vadd.xlane.f32.xlu0 %v2668_v3 }
 0xa73   : > { %2829 = vadd.xlane.f32.xlu0 %v2828_v4 }
 0xafc   : > { %v2670_v28 = vpop.xlane.xlu0 %2669 }
 0xafd   : > { %v2671_v29 = vmul.f32 0.03125, %v2670_v28 }
 0xaff   : > { %v2672_v38 = vadd.f32 1e-05, %v2671_v29 }
 0xb00   : > { %v2830_v41 = vpop.xlane.xlu0 %2829 }
 0xb01   : > { %5918 = vrsqrt.f32 %v2672_v38  ;;  %v2831_v42 = vmul.f32 0.03125, %v2830_v41 }
 0xb03   : > { %v2832_v43 = vsub.f32 %v2825_v2, %v2831_v42 }
 0xb05   : > { %v2833_v46 = vmul.f32 %v2832_v43, %v2832_v43 }
 0xb07   : > { %v2834_v12 = vsel %vm650_vm0, %v2833_v46, 0.0 }
 0xb0b   : > { %v5919_v30 = vpop.eup %5918 }
 0xb0c   : > { %v2674_v31 = vmul.f32 %v5919_v30, %v2666_v0 }
 0xb0e   : > { %5053 = vmatmul.mubr.msk.f32.gmra.mrb[30].mxu1 %vm650_vm0, %v2674_v31 }
 0xb0f   : > { %5463 = vmatprep.mubr.msk.f32.mxu1 %vm6045_vm1, %v6044_v7 }
 0xbe1   : > { %v2752_v36 = vpop.f32.mrb[30].mxu1 }
 0xbe2   : > { %v2753_v37 = vpop.f32.mrb[31].mxu1 }
 0xbe3   : > { %v2757_v40 = vmax.f32 %v2753_v37, 0.0 }
 0xbe5   : > { %5464 = vmatmul.mubr.f32.vlgmr.msra.gmra.mrb[32].mxu1 %v2757_v40 }
 0xbe6   : > { %5468 = vmatprep.mubr.msk.f32.mxu1 %vm6045_vm1, %v6044_v7 }
 0xcb8   : > { %v2907_v13 = vpop.f32.mrb[32].mxu1 }
 0xcb9   : > { %v2908_v62 = vadd.f32 %v2907_v13, %v2674_v31  ;;  %v5465_v44 = vpop.f32.mrb[33].mxu1 }
 0xcbb   : > { %v2911_v45 = vsel %vm650_vm0, %v2908_v62, 0.0 }
 0xcbc   : > { %2912 = vadd.xlane.f32.xlu0 %v2911_v45 }
 0xcc0   : > { %2835 = vadd.xlane.f32.xlu0 %v2834_v12 }
 0xd49   : > { %v2913_v58 = vpop.xlane.xlu0 %2912 }
 0xd4a   : > { %v2914_v59 = vmul.f32 0.03125, %v2913_v58 }
 0xd4c   : > { %v2915_v61 = vsub.f32 %v2908_v62, %v2914_v59 }
 0xd4d   : > { %v2836_v63 = vpop.xlane.xlu0 %2835 }
 0xd4e   : > { %v2837_v0 = vmul.f32 0.03125, %v2836_v63  ;;  %v2916_v1 = vmul.f32 %v2915_v61, %v2915_v61 }
 0xd50   : > { %v2838_v2 = vadd.f32 1e-05, %v2837_v0  ;;  %v2917_v3 = vsel %vm650_vm0, %v2916_v1, 0.0  ;;  %v594_v0 = vld [vmem:[%s7104_s8] sm:$0xff]  ;;  %v595_v1 = vld [vmem:[%s7104_s8 + $0x8] sm:$0xff] }
 0xd51   : > { %2918 = vadd.xlane.f32.xlu0 %v2917_v3  ;;  %v596_v3 = vld [vmem:[%s7104_s8 + $0x10] sm:$0xff] }
 0xd52   : > { %5920 = vrsqrt.f32 %v2838_v2  ;;  %v5752_v2 = vpack.c.bf16 %v595_v1, %v594_v0  ;;  %v600_v0 = vld [vmem:[%s7104_s8 + $0x30] sm:$0xff]  ;;  %v601_v1 = vld [vmem:[%s7104_s8 + $0x38] sm:$0xff] }
 0xd5c   : > { %v5921_v4 = vpop.eup %5920 }
 0xd5d   : > { %v6632_v39 = vmul.f32 %v5921_v4, %v2832_v43  ;;  %v597_v4 = vld [vmem:[%s7104_s8 + $0x18] sm:$0xff] }
 0xd5f   : > { %5054 = vmatmul.mubr.msk.f32.vlgmr.msra.gmra.mrb[26].mxu0 %vm650_vm0, %v6632_v39 }
 0xd60   : > { %3000 = vmatprep.mubr.f32.mxu0 %v6044_v7 }
 0xdde   : > { %v2919_v5 = vpop.xlane.xlu0 %2918 }
 0xddf   : > { %v2920_v6 = vmul.f32 0.03125, %v2919_v5  ;;  %v5749_v5 = vpack.c.bf16 %v597_v4, %v596_v3 }
 0xde1   : > { %v2921_v9 = vadd.f32 1e-05, %v2920_v6 }
 0xde3   : > { %5922 = vrsqrt.f32 %v2921_v9 }
 0xded   : > { %v5923_v10 = vpop.eup %5922 }
 0xdee   : > { %v6637_v11 = vmul.f32 %v5923_v10, %v2915_v61 }
 0xdf0   : > { %5055 = vmatmul.mubr.msk.f32.gmra.mrb[28].mxu0 %vm650_vm0, %v6637_v11 }
 0xdf1   : > { %5478 = vmatprep.mubr.msk.f32.mxu0 %vm6045_vm1, %v6044_v7 }
 0xe32   : > { %v2996_v14 = vpop.f32.mrb[26].mxu0 }
 0xe33   : > { %v6643_v15 = vpop.f32.mrb[27].mxu0 }
 0xec3   : > { %v3002_v16 = vpop.f32.mrb[28].mxu0 }
 0xec4   : > { %3088 = vrot.lane.b32.xlu0 %v3002_v16, %s7152_s4  ;;  %3008 = vrot.lane.b32.xlu1 %v3002_v16, %s7153_s5  ;;  %v6647_v33 = vpop.f32.mrb[29].mxu0 }
 0xec8   : > { %3165 = vrot.lane.b32.xlu0 %v2996_v14, %s7148_s20  ;;  %3086 = vrot.lane.b32.xlu1 %v2996_v14, %s7147_s16 }
 0xecc   : > { %3167 = vrot.lane.b32.xlu1 %v3002_v16, %s7145_s23 }
 0xf36   : > { %v3009_v17 = vpop.permute.xlu1 %3008  ;;  %v3089_v18 = vpop.permute.xlu0 %3088 }
 0xf37   : > { %5467 = vmatpush3.xpose.msk.msra.mxu1 %vm737_vm2, %v3009_v17  ;;  %v603_v17 = vld [vmem:[%s7105_s9 + $0x8] sm:$0xff] }
 0xf38   : > { %5471 = vmatprep.subr.mxu1 %v6044_v7 }
 0xf3a   : > { %5469 = vmatmul.mubr.msk.f32.vlgmr.msra.gmra.mrb[34].mxu1 %vm737_vm2, %v2996_v14  ;;  %v3087_v19 = vpop.permute.xlu1 %3086  ;;  %v3166_v21 = vpop.permute.xlu0 %3165 }
 0xf3b   : > { %5472 = vmatpush3.xpose.msk.msra.mxu1 %vm737_vm2, %v3089_v18  ;;  %5473 = vmatprep.mubr.msk.f32.mxu1 %vm6045_vm1, %v6044_v7 }
 0xf3c   : > { %5481 = vmatprep.subr.mxu1 %v6044_v7 }
 0xf3e   : > { %5474 = vmatmul.mubr.msk.f32.vlgmr.msra.gmra.mrb[36].mxu1 %vm737_vm2, %v3087_v19  ;;  %v3168_v20 = vpop.permute.xlu1 %3167  ;;  %v604_v19 = vld [vmem:[%s7105_s9 + $0x10] sm:$0xff] }
 0xf3f   : > { %5477 = vmatpush3.xpose.msk.msra.mxu0 %vm737_vm2, %v3168_v20  ;;  %5483 = vmatprep.mubr.msk.f32.mxu1 %vm6045_vm1, %v6044_v7  ;;  %v605_v20 = vld [vmem:[%s7105_s9 + $0x18] sm:$0xff] }
 0xf40   : > { %5486 = vmatprep.subr.mxu0 %v6044_v7 }
 0xf42   : > { %5479 = vmatmul.mubr.msk.f32.vlgmr.msra.gmra.mrb[30].mxu0 %vm737_vm2, %v3166_v21 }
 0xf43   : > { %5487 = vmatpush3.msra.mxu0 %v6643_v15  ;;  %5488 = vmatprep.mubr.msk.f32.mxu0 %vm6045_vm1, %v6044_v7 }
 0xf44   : > { %5496 = vmatprep.subr.mxu0 %v6044_v7 }
0x100d   : > { %v3081_v22 = vpop.f32.mrb[34].mxu1 }
0x100e   : > { %v3085_v23 = vmul.f32 0.25, %v3081_v22  ;;  %v5470_v24 = vpop.f32.mrb[35].mxu1 }
0x1010   : > { %v3323_v25 = vsel %vm1050_vm3, %v3085_v23, -inf }
0x1011   : > { %3324 = vmax.xlane.f32.xlu1 %v3323_v25  ;;  %v3160_v26 = vpop.f32.mrb[36].mxu1 }
0x1012   : > { %v3164_v27 = vmul.f32 0.25, %v3160_v26  ;;  %v5475_v28 = vpop.f32.mrb[37].mxu1 }
0x1014   : > { %v3326_v29 = vsel %vm1050_vm3, %v3164_v27, -inf }
0x1015   : > { %3327 = vmax.xlane.f32.xlu0 %v3326_v29  ;;  %v3239_v38 = vpop.f32.mrb[30].mxu0 }
0x1016   : > { %v5480_v30 = vpop.f32.mrb[31].mxu0  ;;  %v3243_v45 = vmul.f32 0.25, %v3239_v38 }
0x1018   : > { %v3329_v46 = vsel %vm1050_vm3, %v3243_v45, -inf }
0x1022   : > { %3244 = vrot.lane.b32.xlu1 %v2996_v14, %s7149_s24 }
0x1026   : > { %3441 = vrot.lane.b32.xlu1 %v6647_v33, %s7153_s5  ;;  %s4844_s5 = scalar_lea.sflag [#allocation3], %s6996_s27 }
0x102b   : > { %3246 = vrot.lane.b32.xlu0 %v3002_v16, %s7154_s17  ;;  %v602_v16 = vld [vmem:[%s7105_s9] sm:$0xff] }
0x102c   : > { %v5758_v18 = vpack.c.bf16 %v603_v17, %v602_v16 }
0x109e   : > { %v3325_v31 = vpop.xlane.xlu1 %3324 }
0x109f   : > { %v3335_v32 = vsub.f32 %v3085_v23, %v3325_v31 }
0x10a1   : > { %v3339_v34 = vmul.f32 1.442695, %v3335_v32 }
0x10a2   : > { %v3328_v35 = vpop.xlane.xlu0 %3327  ;;  %v3245_v37 = vpop.permute.xlu1 %3244 }
0x10a3   : > { %5924 = vpow2.f32 %v3339_v34  ;;  %v3336_v36 = vsub.f32 %v3164_v27, %v3328_v35  ;;  %v5755_v27 = vpack.c.bf16 %v605_v20, %v604_v19  ;;  %v606_v35 = vld [vmem:[%s7105_s9 + $0x20] sm:$0xff] }
0x10a5   : > { %v3341_v40 = vmul.f32 1.442695, %v3336_v36  ;;  %v607_v36 = vld [vmem:[%s7105_s9 + $0x28] sm:$0xff] }
0x10a6   : > { %v3247_v41 = vpop.permute.xlu0 %3246  ;;  %v3442_v42 = vpop.permute.xlu1 %3441 }
0x10a7   : > { %5926 = vpow2.f32 %v3341_v40  ;;  %5482 = vmatpush3.xpose.msk.msra.mxu1 %vm737_vm2, %v3247_v41  ;;  %v598_v40 = vld [vmem:[%s7104_s8 + $0x20] sm:$0xff] }
0x10a8   : > { %5491 = vmatprep.subr.mxu1 %v6044_v7 }
0x10aa   : > { %5484 = vmatmul.mubr.msk.f32.vlgmr.msra.gmra.mrb[38].mxu1 %vm737_vm2, %v3245_v37  ;;  %v5764_v37 = vpack.c.bf16 %v607_v36, %v606_v35 }
0x10ab   : > { %5492 = vmatpush3.msra.mxu1 %v3442_v42  ;;  %5493 = vmatprep.mubr.msk.f32.mxu1 %vm6045_vm1, %v6044_v7 }
0x10ac   : > { %5501 = vmatprep.subr.mxu1 %v6044_v7 }
0x10ad   : > { %v5925_v43 = vpop.eup %5924 }
0x10ae   : > { %v3347_v13 = vsel %vm1050_vm3, %v5925_v43, 0.0 }
0x10af   : > { %3348 = vadd.xlane.f32.xlu0 %v3347_v13 }
0x10b1   : > { %v5927_v62 = vpop.eup %5926 }
0x10b2   : > { %v3350_v44 = vsel %vm1050_vm3, %v5927_v62, 0.0 }
0x10b3   : > { %3351 = vadd.xlane.f32.xlu1 %v3350_v44 }
0x10c4   : > { %3591 = vrot.lane.b32.xlu1 %v6647_v33, %s7152_s4 }
0x10c5   : > { %3515 = vrot.lane.b32.xlu0 %v6643_v15, %s7147_s16  ;;  %s6054_s16 = smov 8  }
0x10e4   : > { %3330 = vmax.xlane.f32.xlu0 %v3329_v46 }
0x10fa   : > { %3956 = vrot.lane.b32.xlu0 %v6643_v15, %s7148_s20  ;;  %s6055_s20 = smov 24  }
0x113c   : > { %v3349_v12 = vpop.xlane.xlu0 %3348 }
0x113d   : > { %5928 = vrcp.f32 %v3349_v12 }
0x1140   : > { %v3352_v47 = vpop.xlane.xlu1 %3351  ;;  %v3516_v50 = vpop.permute.xlu0 %3515 }
0x1141   : > { %5930 = vrcp.f32 %v3352_v47 }
0x1144   : > { %v3592_v51 = vpop.permute.xlu1 %3591 }
0x1147   : > { %v5929_v48 = vpop.eup %5928 }
0x1148   : > { %v6690_v49 = vmul.f32 %v5929_v48, %v5925_v43 }
0x114a   : > { %5489 = vmatmul.mubr.msk.f32.vlgmr.msra.gmra.mrb[32].mxu0 %vm1050_vm3, %v6690_v49  ;;  %5494 = vmatmul.mubr.msk.f32.vlgmr.msra.gmra.mrb[40].mxu1 %vm1050_vm3, %v6690_v49 }
0x114b   : > { %v5931_v8 = vpop.eup %5930  ;;  %5497 = vmatpush3.msra.mxu0 %v3516_v50  ;;  %5502 = vmatpush3.msra.mxu1 %v3592_v51 }
0x114c   : > { %v6696_v52 = vmul.f32 %v5931_v8, %v5927_v62  ;;  %5498 = vmatprep.mubr.msk.f32.mxu0 %vm6045_vm1, %v6044_v7  ;;  %5503 = vmatprep.mubr.msk.f32.mxu1 %vm6045_vm1, %v6044_v7 }
0x114d   : > { %5751 = vmatprep.subr.bf16.mxu1 %v6053_v60  ;;  %5748 = vmatprep.subr.bf16.mxu0 %v6053_v60 }
0x114e   : > { %5499 = vmatmul.mubr.msk.f32.vlgmr.msra.gmra.mrb[34].mxu0 %vm1050_vm3, %v6696_v52  ;;  %5504 = vmatmul.mubr.msk.f32.vlgmr.msra.gmra.mrb[42].mxu1 %vm1050_vm3, %v6696_v52 }
0x114f   : > { %5517 = vmatprep.mubr.msk.f32.mxu1 %vm6045_vm1, %v6044_v7  ;;  %5510 = vmatprep.mubr.msk.f32.mxu0 %vm6045_vm1, %v6044_v7 }
0x1150   : > { %5753 = vmatpush3.bf16.msra.mxu1 %v5752_v2  ;;  %5750 = vmatpush3.bf16.msra.mxu0 %v5749_v5  ;;  %v5767_v2 = vpack.c.bf16 %v601_v1, %v600_v0  ;;  %v627_v0 = vld [vmem:[%s7107_s11 + $0x48] sm:$0xff] }
0x1151   : > { %5757 = vmatprep.subr.bf16.mxu1 %v6053_v60  ;;  %5754 = vmatprep.subr.bf16.mxu0 %v6053_v60 }
0x1171   : > { %v3331_v53 = vpop.xlane.xlu0 %3330 }
0x1172   : > { %v3337_v54 = vsub.f32 %v3243_v45, %v3331_v53 }
0x1174   : > { %v3343_v55 = vmul.f32 1.442695, %v3337_v54 }
0x1175   : > { %v3957_v6 = vpop.permute.xlu0 %3956 }
0x1176   : > { %5932 = vpow2.f32 %v3343_v55 }
0x117d   : > { %v3318_v56 = vpop.f32.mrb[38].mxu1 }
0x117e   : > { %v3322_v57 = vmul.f32 0.25, %v3318_v56  ;;  %v5485_v58 = vpop.f32.mrb[39].mxu1 }
0x1180   : > { %v5933_v59 = vpop.eup %5932  ;;  %v3332_v61 = vsel %vm1050_vm3, %v3322_v57, -inf }
0x1181   : > { %3333 = vmax.xlane.f32.xlu0 %v3332_v61  ;;  %v3353_v63 = vsel %vm1050_vm3, %v5933_v59, 0.0  ;;  %v609_v61 = vld [vmem:[%s7105_s9 + $0x38] sm:$0xff] }
0x1182   : > { %3354 = vadd.xlane.f32.xlu1 %v3353_v63 }
0x1193   : > { %4032 = vrot.lane.b32.xlu1 %v6647_v33, %s7145_s23  ;;  %s5084_s23 = sshll.u32 %s6159_s22, 7 }
0x1194   : > { %s7013_s2 = scalar_lea.hbm %s7109_s13, %s5084_s23 }
0x1197   : > { %4253 = vrot.lane.b32.xlu0 %v6643_v15, %s7149_s24 }
0x120e   : > { %v3334_v9 = vpop.xlane.xlu0 %3333 }
0x120f   : > { %v3338_v10 = vsub.f32 %v3322_v57, %v3334_v9  ;;  %v3355_v15 = vpop.xlane.xlu1 %3354 }
0x1211   : > { %v3345_v14 = vmul.f32 1.442695, %v3338_v10 }
0x1212   : > { %v4254_v57 = vpop.permute.xlu0 %4253 }
0x1213   : > { %5934 = vpow2.f32 %v3345_v14  ;;  %v4033_v28 = vpop.permute.xlu1 %4032 }
0x1214   : > { %5936 = vrcp.f32 %v3355_v15 }
0x121d   : > { %v6744_v21 = vpop.eup %5934  ;;  %v3436_v22 = vpop.f32.mrb[32].mxu0 }
0x121e   : > { %v3510_v23 = vpop.f32.mrb[40].mxu1  ;;  %v5490_v24 = vpop.f32.mrb[33].mxu0  ;;  %5518 = vmatmul.mubr.msk.f32.vlgmr.msra.gmra.mrb[44].mxu1 %vm737_vm2, %v3436_v22  ;;  %v3356_v26 = vsel %vm1050_vm3, %v6744_v21, 0.0 }
0x121f   : > { %v5495_v25 = vpop.f32.mrb[41].mxu1  ;;  %5759 = vmatpush3.bf16.msra.mxu1 %v5758_v18  ;;  %3357 = vadd.xlane.f32.xlu1 %v3356_v26  ;;  %v5937_v29 = vpop.eup %5936 }
0x1220   : > { %5531 = vmatprep.mubr.msk.f32.mxu1 %vm6045_vm1, %v6044_v7  ;;  %5539 = vmatprep.subr.mxu1 %v6044_v7  ;;  %v6754_v34 = vmul.f32 %v5937_v29, %v5933_v59  ;;  %v608_v59 = vld [vmem:[%s7105_s9 + $0x30] sm:$0xff] }
0x1221   : > { %v3587_v38 = vpop.f32.mrb[34].mxu0  ;;  %v3660_v30 = vpop.f32.mrb[42].mxu1  ;;  %v5770_v63 = vpack.c.bf16 %v609_v61, %v608_v59  ;;  %v625_v59 = vld [vmem:[%s7107_s11 + $0x38] sm:$0xff] }
0x1222   : > { %v5500_v31 = vpop.f32.mrb[35].mxu0  ;;  %v5505_v32 = vpop.f32.mrb[43].mxu1  ;;  %5511 = vmatmul.mubr.msk.f32.vlgmr.msra.gmra.mrb[36].mxu0 %vm737_vm2, %v3587_v38  ;;  %5532 = vmatmul.mubr.msk.f32.vlgmr.msra.gmra.mrb[46].mxu1 %vm737_vm2, %v3510_v23 }
0x1223   : > { %5756 = vmatpush3.bf16.msra.mxu0 %v5755_v27  ;;  %5540 = vmatpush3.msra.mxu1 %v4033_v28 }
0x1224   : > { %5524 = vmatprep.mubr.msk.f32.mxu0 %vm6045_vm1, %v6044_v7  ;;  %5534 = vmatprep.subr.mxu0 %v6044_v7 }
0x1225   : > { %5541 = vmatprep.mubr.msk.f32.mxu1 %vm6045_vm1, %v6044_v7  ;;  %5763 = vmatprep.subr.bf16.mxu1 %v6053_v60 }
0x1226   : > { %5525 = vmatmul.mubr.msk.f32.vlgmr.msra.gmra.mrb[38].mxu0 %vm737_vm2, %v3660_v30  ;;  %5542 = vmatmul.mubr.msk.f32.vlgmr.msra.gmra.mrb[48].mxu1 %vm1050_vm3, %v6754_v34 }
0x1227   : > { %5535 = vmatpush3.msra.mxu0 %v3957_v6  ;;  %5536 = vmatprep.mubr.msk.f32.mxu0 %vm6045_vm1, %v6044_v7 }
0x1228   : > { %5760 = vmatprep.subr.bf16.mxu0 %v6053_v60  ;;  %5555 = vmatprep.mubr.msk.f32.mxu1 %vm6045_vm1, %v6044_v7 }
0x1229   : > { %5765 = vmatpush3.bf16.msra.mxu1 %v5764_v37  ;;  %v611_v37 = vld [vmem:[%s7106_s10 + $0x8] sm:$0xff] }
0x122a   : > { %5537 = vmatmul.mubr.msk.f32.vlgmr.msra.gmra.mrb[40].mxu0 %vm1050_vm3, %v6754_v34  ;;  %5563 = vmatprep.subr.mxu1 %v6044_v7 }
0x122b   : > { %5548 = vmatprep.mubr.msk.f32.mxu0 %vm6045_vm1, %v6044_v7 }
0x1230   : > { %4329 = vrot.lane.b32.xlu1 %v6647_v33, %s7154_s17  ;;  %v599_v33 = vld [vmem:[%s7104_s8 + $0x28] sm:$0xff] }
0x1231   : > { %v5761_v41 = vpack.c.bf16 %v599_v33, %v598_v40  ;;  %v613_v40 = vld [vmem:[%s7106_s10 + $0x18] sm:$0xff] }
0x1232   : > { %v5772_v33 = vpack.c.bf16 %v613_v40, %v611_v37  ;;  %v645_v37 = vld [vmem:[%s7108_s12 + $0x58] sm:$0xff] }
0x1233   : > { %5762 = vmatpush3.bf16.msra.mxu0 %v5761_v41  ;;  %v610_v41 = vld [vmem:[%s7106_s10] sm:$0xff] }
0x1234   : > { %5558 = vmatprep.subr.mxu0 %v6044_v7 }
0x12ac   : > { %v3358_v42 = vpop.xlane.xlu1 %3357 }
0x12ad   : > { %5938 = vrcp.f32 %v3358_v42  ;;  %v612_v42 = vld [vmem:[%s7106_s10 + $0x10] sm:$0xff] }
0x12b0   : > { %v4330_v47 = vpop.permute.xlu1 %4329 }
0x12b7   : > { %v5939_v48 = vpop.eup %5938 }
0x12b8   : > { %v6794_v55 = vmul.f32 %v5939_v48, %v6744_v21  ;;  %v619_v48 = vld [vmem:[%s7107_s11 + $0x8] sm:$0xff] }
0x12f1   : > { %v3806_v43 = vpop.f32.mrb[44].mxu1 }
0x12f2   : > { %v5519_v13 = vpop.f32.mrb[45].mxu1 }
0x12f3   : > { %v5774_v13 = vpack.c.bf16 %v612_v42, %v610_v41  ;;  %v633_v41 = vld [vmem:[%s7107_s11 + $0x78] sm:$0xff] }
0x12f5   : > { %v3733_v62 = vpop.f32.mrb[36].mxu0  ;;  %v3952_v44 = vpop.f32.mrb[46].mxu1 }
0x12f6   : > { %v3807_v45 = vadd.f32 %v3806_v43, %v3733_v62  ;;  %v5512_v46 = vpop.f32.mrb[37].mxu0  ;;  %v5533_v12 = vpop.f32.mrb[47].mxu1  ;;  %v615_v43 = vld [vmem:[%s7106_s10 + $0x28] sm:$0xff]  ;;  %v617_v62 = vld [vmem:[%s7106_s10 + $0x38] sm:$0xff] }
0x12f7   : > { %v5776_v46 = vpack.c.bf16 %v617_v62, %v615_v43  ;;  %v646_v43 = vld [vmem:[%s7108_s12 + $0x60] sm:$0xff] }
0x12f9   : > { %v3879_v50 = vpop.f32.mrb[38].mxu0  ;;  %v4101_v51 = vpop.f32.mrb[48].mxu1 }
0x12fa   : > { %v3953_v8 = vadd.f32 %v3952_v44, %v3879_v50  ;;  %v5526_v53 = vpop.f32.mrb[39].mxu0  ;;  %v5543_v54 = vpop.f32.mrb[49].mxu1  ;;  %5556 = vmatmul.mubr.msk.f32.vlgmr.msra.gmra.mrb[50].mxu1 %vm737_vm2, %v4101_v51  ;;  %v614_v44 = vld [vmem:[%s7106_s10 + $0x20] sm:$0xff]  ;;  %v620_v50 = vld [vmem:[%s7107_s11 + $0x10] sm:$0xff] }
0x12fb   : > { %5564 = vmatpush3.msra.mxu1 %v4330_v47  ;;  %5565 = vmatprep.mubr.msk.f32.mxu1 %vm6045_vm1, %v6044_v7  ;;  %v618_v47 = vld [vmem:[%s7107_s11] sm:$0xff] }
0x12fc   : > { %5769 = vmatprep.subr.bf16.mxu1 %v6053_v60  ;;  %v5781_v51 = vpack.c.bf16 %v619_v48, %v618_v47  ;;  %v622_v54 = vld [vmem:[%s7107_s11 + $0x20] sm:$0xff] }
0x12fd   : > { %v4028_v56 = vpop.f32.mrb[40].mxu0 }
0x12fe   : > { %v5538_v58 = vpop.f32.mrb[41].mxu0  ;;  %5549 = vmatmul.mubr.msk.f32.vlgmr.msra.gmra.mrb[42].mxu0 %vm737_vm2, %v4028_v56  ;;  %5566 = vmatmul.mubr.msk.f32.vlgmr.msra.gmra.mrb[52].mxu1 %vm1050_vm3, %v6794_v55  ;;  %v623_v56 = vld [vmem:[%s7107_s11 + $0x28] sm:$0xff] }
0x12ff   : > { %5559 = vmatpush3.msra.mxu0 %v4254_v57  ;;  %5560 = vmatprep.mubr.msk.f32.mxu0 %vm6045_vm1, %v6044_v7  ;;  %v5787_v57 = vpack.c.bf16 %v623_v56, %v622_v54  ;;  %v624_v58 = vld [vmem:[%s7107_s11 + $0x30] sm:$0xff] }
0x1300   : > { %5579 = vmatprep.mubr.msk.f32.mxu1 %vm6045_vm1, %v6044_v7  ;;  %5766 = vmatprep.subr.bf16.mxu0 %v6053_v60  ;;  %v5790_v61 = vpack.c.bf16 %v625_v59, %v624_v58 }
0x1301   : > { %5771 = vmatpush3.bf16.msra.mxu1 %v5770_v63  ;;  %v626_v63 = vld [vmem:[%s7107_s11 + $0x40] sm:$0xff] }
0x1302   : > { %5561 = vmatmul.mubr.msk.f32.vlgmr.msra.gmra.mrb[44].mxu0 %vm1050_vm3, %v6794_v55  ;;  %5780 = vmatprep.subr.bf16.mxu1 %v6053_v60  ;;  %v5793_v1 = vpack.c.bf16 %v627_v0, %v626_v63 }
0x1303   : > { %5572 = vmatprep.mubr.msk.f32.mxu0 %vm6045_vm1, %v6044_v7  ;;  %5768 = vmatpush3.bf16.msra.mxu0 %v5767_v2  ;;  %v628_v2 = vld [vmem:[%s7107_s11 + $0x50] sm:$0xff] }
0x1304   : > { %5773 = vmatprep.subr.bf16.mxu0 %v5772_v33  ;;  %v632_v33 = vld [vmem:[%s7107_s11 + $0x70] sm:$0xff] }
0x1305   : > { %v5802_v42 = vpack.c.bf16 %v633_v41, %v632_v33 }
0x13cd   : > { %v4248_v3 = vpop.f32.mrb[50].mxu1 }
0x13ce   : > { %v4252_v4 = vadd.f32 %v4248_v3, %v3953_v8  ;;  %v5557_v5 = vpop.f32.mrb[51].mxu1  ;;  %v621_v8 = vld [vmem:[%s7107_s11 + $0x18] sm:$0xff] }
0x13cf   : > { %v5784_v53 = vpack.c.bf16 %v621_v8, %v620_v50  ;;  %v629_v3 = vld [vmem:[%s7107_s11 + $0x58] sm:$0xff]  ;;  %v630_v5 = vld [vmem:[%s7107_s11 + $0x60] sm:$0xff] }
0x13d1   : > { %v4174_v6 = vpop.f32.mrb[42].mxu0  ;;  %v4398_v9 = vpop.f32.mrb[52].mxu1 }
0x13d2   : > { %v4178_v10 = vadd.f32 %v4174_v6, %v3807_v45  ;;  %v5550_v14 = vpop.f32.mrb[43].mxu0  ;;  %v5567_v15 = vpop.f32.mrb[53].mxu1  ;;  %5580 = vmatmul.mubr.msk.f32.vlgmr.msra.gmra.mrb[54].mxu1 %vm737_vm2, %v4398_v9  ;;  %v616_v45 = vld [vmem:[%s7106_s10 + $0x30] sm:$0xff]  ;;  %v631_v6 = vld [vmem:[%s7107_s11 + $0x68] sm:$0xff] }
0x13d3   : > { %5614 = vmatprep.mubr.msk.f32.mxu1 %vm6045_vm1, %v6044_v7  ;;  %v5778_v12 = vpack.c.bf16 %v616_v45, %v614_v44  ;;  %5782 = vmatpush3.bf16.msra.mxu1 %v5781_v51  ;;  %v5799_v9 = vpack.c.bf16 %v631_v6, %v630_v5  ;;  %v648_v44 = vld [vmem:[%s7108_s12 + $0x70] sm:$0xff]  ;;  %v649_v45 = vld [vmem:[%s7108_s12 + $0x78] sm:$0xff] }
0x13d4   : > { %5783 = vmatprep.subr.bf16.mxu1 %v6053_v60 }
0x13d5   : > { %v4325_v16 = vpop.f32.mrb[44].mxu0 }
0x13d6   : > { %v5562_v17 = vpop.f32.mrb[45].mxu0  ;;  %5573 = vmatmul.mubr.msk.f32.vlgmr.msra.gmra.mrb[46].mxu0 %vm737_vm2, %v4325_v16 }
0x13d7   : > { %4662 = vmatprep.mubr.f32.mxu0 %v6044_v7  ;;  %5775 = vmatpush1.bf16.msra.mxu0 %v5774_v13  ;;  %v647_v13 = vld [vmem:[%s7108_s12 + $0x68] sm:$0xff] }
0x13d8   : > { %5777 = vmatprep.subr.bf16.mxu0 %v5776_v46  ;;  %5785 = vmatpush3.bf16.msra.mxu1 %v5784_v53  ;;  %v5823_v62 = vpack.c.bf16 %v647_v13, %v646_v43  ;;  %v5826_v46 = vpack.c.bf16 %v649_v45, %v648_v44 }
0x13d9   : > { %5786 = vmatprep.subr.bf16.mxu1 %v6053_v60 }
0x13db   : > { %5779 = vmatpush1.bf16.msra.mxu0 %v5778_v12 }
0x13dc   : > { %5804 = vmatprep.subr.bf16.mxu0 %v6053_v60  ;;  %5788 = vmatpush3.bf16.msra.mxu1 %v5787_v57 }
0x13dd   : > { %5789 = vmatprep.subr.bf16.mxu1 %v6053_v60 }
0x13e0   : > { %5791 = vmatpush3.bf16.msra.mxu1 %v5790_v61 }
0x13e1   : > { %5792 = vmatprep.subr.bf16.mxu1 %v6053_v60 }
0x13e4   : > { %5794 = vmatpush3.bf16.msra.mxu1 %v5793_v1 }
0x13e5   : > { %5795 = vmatprep.subr.bf16.mxu1 %v6053_v60 }
0x14a5   : > { %v4545_v18 = vpop.f32.mrb[54].mxu1 }
0x14a6   : > { %v4549_v19 = vadd.f32 %v4545_v18, %v4252_v4  ;;  %v5581_v20 = vpop.f32.mrb[55].mxu1  ;;  %v5796_v4 = vpack.c.bf16 %v629_v3, %v628_v2 }
0x14a7   : > { %v635_v20 = vld [vmem:[%s7108_s12 + $0x8] sm:$0xff] }
0x14a8   : > { %v4564_v21 = vadd.f32 %v4549_v19, %v6637_v11  ;;  %5797 = vmatpush3.bf16.msra.mxu1 %v5796_v4  ;;  %v634_v19 = vld [vmem:[%s7108_s12] sm:$0xff] }
0x14a9   : > { %v4471_v22 = vpop.f32.mrb[46].mxu0  ;;  %5798 = vmatprep.subr.bf16.mxu1 %v6053_v60 }
0x14aa   : > { %v4475_v23 = vadd.f32 %v4471_v22, %v4178_v10  ;;  %v5574_v24 = vpop.f32.mrb[47].mxu0  ;;  %v4565_v25 = vsel %vm650_vm0, %v4564_v21, 0.0  ;;  %v5805_v22 = vpack.c.bf16 %v635_v20, %v634_v19 }
0x14ab   : > { %4566 = vadd.xlane.f32.xlu1 %v4565_v25  ;;  %v636_v24 = vld [vmem:[%s7108_s12 + $0x10] sm:$0xff]  ;;  %v637_v25 = vld [vmem:[%s7108_s12 + $0x18] sm:$0xff] }
0x14ac   : > { %v4550_v26 = vadd.f32 %v4475_v23, %v6632_v39  ;;  %5800 = vmatpush3.bf16.msra.mxu1 %v5799_v9 }
0x14ad   : > { %5801 = vmatprep.subr.bf16.mxu1 %v6053_v60 }
0x14ae   : > { %v4551_v27 = vsel %vm650_vm0, %v4550_v26, 0.0 }
0x14af   : > { %4552 = vadd.xlane.f32.xlu0 %v4551_v27  ;;  %v5808_v27 = vpack.c.bf16 %v637_v25, %v636_v24 }
0x14b0   : > { %5803 = vmatpush3.bf16.msra.mxu1 %v5802_v42 }
0x1538   : > { %v4567_v28 = vpop.xlane.xlu1 %4566 }
0x1539   : > { %v4568_v29 = vmul.f32 0.03125, %v4567_v28 }
0x153b   : > { %v6831_v31 = vsub.f32 %v4564_v21, %v4568_v29  ;;  %v638_v29 = vld [vmem:[%s7108_s12 + $0x20] sm:$0xff] }
0x153c   : > { %v4553_v38 = vpop.xlane.xlu0 %4552 }
0x153d   : > { %v4554_v30 = vmul.f32 0.03125, %v4553_v38  ;;  %v4570_v36 = vmul.f32 %v6831_v31, %v6831_v31  ;;  %v639_v38 = vld [vmem:[%s7108_s12 + $0x28] sm:$0xff] }
0x153f   : > { %v6833_v32 = vsub.f32 %v4550_v26, %v4554_v30  ;;  %v4571_v39 = vsel %vm650_vm0, %v4570_v36, 0.0  ;;  %v5811_v30 = vpack.c.bf16 %v639_v38, %v638_v29 }
0x1541   : > { %v4556_v11 = vmul.f32 %v6833_v32, %v6833_v32 }
0x1543   : > { %v4557_v35 = vsel %vm650_vm0, %v4556_v11, 0.0 }
0x1544   : > { %4558 = vadd.xlane.f32.xlu0 %v4557_v35  ;;  %v642_v35 = vld [vmem:[%s7108_s12 + $0x40] sm:$0xff] }
0x1548   : > { %4572 = vadd.xlane.f32.xlu0 %v4571_v39  ;;  %v644_v39 = vld [vmem:[%s7108_s12 + $0x50] sm:$0xff] }
0x1549   : > { %v5820_v40 = vpack.c.bf16 %v645_v37, %v644_v39 }
0x15d1   : > { %v4559_v10 = vpop.xlane.xlu0 %4558 }
0x15d2   : > { %v4560_v14 = vmul.f32 0.03125, %v4559_v10 }
0x15d4   : > { %v4561_v15 = vadd.f32 1e-05, %v4560_v14 }
0x15d5   : > { %v4573_v16 = vpop.xlane.xlu0 %4572 }
0x15d6   : > { %5940 = vrsqrt.f32 %v4561_v15  ;;  %v4574_v17 = vmul.f32 0.03125, %v4573_v16 }
0x15d8   : > { %v4575_v18 = vadd.f32 1e-05, %v4574_v17 }
0x15da   : > { %5942 = vrsqrt.f32 %v4575_v18 }
0x15e0   : > { %v5941_v21 = vpop.eup %5940 }
0x15e1   : > { %v4563_v23 = vmul.f32 %v5941_v21, %v6833_v32  ;;  %v641_v32 = vld [vmem:[%s7108_s12 + $0x38] sm:$0xff] }
0x15e3   : > { %5080 = vmatmul.mubr.msk.f32.vlgmr.msra.gmra.mrb[48].mxu0 %vm650_vm0, %v4563_v23 }
0x15e4   : > { %v5943_v26 = vpop.eup %5942  ;;  %4667 = vmatprep.mubr.f32.mxu0 %v6044_v7  ;;  %5806 = vmatpush3.bf16.msra.mxu0 %v5805_v22 }
0x15e5   : > { %v4577_v28 = vmul.f32 %v5943_v26, %v6831_v31  ;;  %5807 = vmatprep.subr.bf16.mxu0 %v6053_v60  ;;  %v640_v31 = vld [vmem:[%s7108_s12 + $0x30] sm:$0xff] }
0x15e6   : > { %v5814_v11 = vpack.c.bf16 %v641_v32, %v640_v31 }
0x15e7   : > { %5081 = vmatmul.mubr.msk.f32.gmra.mrb[50].mxu0 %vm650_vm0, %v4577_v28 }
0x15e8   : > { %5809 = vmatpush3.bf16.msra.mxu0 %v5808_v27  ;;  %5649 = vmatprep.mubr.msk.f32.mxu0 %vm6045_vm1, %v6044_v7  ;;  %v643_v7 = vld [vmem:[%s7108_s12 + $0x48] sm:$0xff] }
0x15e9   : > { %5810 = vmatprep.subr.bf16.mxu0 %v6053_v60  ;;  %v5817_v36 = vpack.c.bf16 %v643_v7, %v642_v35 }
0x15ec   : > { %5812 = vmatpush3.bf16.msra.mxu0 %v5811_v30 }
0x15ed   : > { %5813 = vmatprep.subr.bf16.mxu0 %v6053_v60 }
0x15f0   : > { %5815 = vmatpush3.bf16.msra.mxu0 %v5814_v11 }
0x15f1   : > { %5816 = vmatprep.subr.bf16.mxu0 %v6053_v60 }
0x15f4   : > { %5818 = vmatpush3.bf16.msra.mxu0 %v5817_v36 }
0x15f5   : > { %5819 = vmatprep.subr.bf16.mxu0 %v6053_v60 }
0x15f8   : > { %5821 = vmatpush3.bf16.msra.mxu0 %v5820_v40 }
0x15f9   : > { %5822 = vmatprep.subr.bf16.mxu0 %v6053_v60 }
0x15fc   : > { %5824 = vmatpush3.bf16.msra.mxu0 %v5823_v62 }
0x15fd   : > { %5825 = vmatprep.subr.bf16.mxu0 %v6053_v60 }
0x1600   : > { %5827 = vmatpush3.bf16.msra.mxu0 %v5826_v46 }
0x16b6   : > { %v4664_v12 = vpop.f32.mrb[48].mxu0 }
0x16b7   : > { %v4673_v47 = vmax.f32 %v4664_v12, 0.0  ;;  %v4666_v48 = vpop.f32.mrb[49].mxu0 }
0x16b9   : > { %5615 = vmatmul.mubr.f32.vlgmr.msra.gmra.mrb[56].mxu1 %v4673_v47 }
0x16ba   : > { %v4669_v50 = vpop.f32.mrb[50].mxu0 }
0x16bb   : > { %v4670_v51 = vpop.f32.mrb[51].mxu0 }
0x16bc   : > { %v4674_v8 = vmax.f32 %v4670_v51, 0.0 }
0x16be   : > { %5650 = vmatmul.mubr.f32.vlgmr.msra.gmra.mrb[52].mxu0 %v4674_v8 }
0x178c   : > { %v4741_v53 = vpop.f32.mrb[56].mxu1 }
0x178d   : > { %v4742_v60 = vadd.f32 %v4741_v53, %v4563_v23  ;;  %v5616_v54 = vpop.f32.mrb[57].mxu1 }
0x178f   : > { %v4745_v56 = vsel %vm650_vm0, %v4742_v60, 0.0 }
0x1790   : > { %4746 = vadd.xlane.f32.xlu1 %v4745_v56 }
0x1791   : > { %v4824_v57 = vpop.f32.mrb[52].mxu0 }
0x1792   : > { %v4825_v58 = vadd.f32 %v4824_v57, %v4577_v28  ;;  %v5651_v59 = vpop.f32.mrb[53].mxu0 }
0x1794   : > { %v4828_v61 = vsel %vm650_vm0, %v4825_v58, 0.0 }
0x1795   : > { %4829 = vadd.xlane.f32.xlu0 %v4828_v61 }
0x17a1   : > { %4578 = vrot.lane.b32.xlu1 %v6696_v52, %s6054_s16 }
0x181d   : > { %v4747_v63 = vpop.xlane.xlu1 %4746 }
0x181e   : > { %v4748_v0 = vmul.f32 0.03125, %v4747_v63 }
0x1820   : > { %v4749_v1 = vsub.f32 %v4742_v60, %v4748_v0 }
0x1821   : > { %v4579_v52 = vpop.permute.xlu1 %4578 }
0x1822   : > { %v4830_v2 = vpop.xlane.xlu0 %4829  ;;  %v4750_v3 = vmul.f32 %v4749_v1, %v4749_v1 }
0x1823   : > { %v4831_v4 = vmul.f32 0.03125, %v4830_v2 }
0x1824   : > { %v4751_v5 = vsel %vm650_vm0, %v4750_v3, 0.0 }
0x1825   : > { %v6987_v6 = vsub.f32 %v4825_v58, %v4831_v4  ;;  %4752 = vadd.xlane.f32.xlu1 %v4751_v5 }
0x1827   : > { %v4833_v9 = vmul.f32 %v6987_v6, %v6987_v6 }
0x1829   : > { %v4834_v10 = vsel %vm650_vm0, %v4833_v9, 0.0 }
0x182a   : > { %4835 = vadd.xlane.f32.xlu0 %v4834_v10 }
0x1836   : > { %4584 = vrot.lane.b32.xlu1 %v6794_v55, %s6055_s20  ;;  %s6056_s20 = smov [#allocation2]  }
0x1837   : > { %s5952_s26 = sshll.u32 %s6056_s20, 4  ;;  %s5953_s26 = int_to_ptr.vmem [resolvable:$false] %s5952_s26 }
0x1838   : > { %s5954_s0 = scalar_lea.vmem %s5953_s26, 256 }
0x1840   : > { %4581 = vrot.lane.b32.xlu0 %v6754_v34, %s7154_s17  ;;  %v4587_v34 = vsel %vm1050_vm3, %v6690_v49, %v4579_v52  ;;  %s5013_s17 = sshll.u32 %s6996_s27, 3 }
0x1841   : > { %s502_s1 = scalar_lea.vmem [#allocation2], %s5013_s17  ;;  %s7018_s25 = scalar_lea.vmem [#allocation4], %s5013_s17 }
0x1842   : > { %s4866_s24 = sshll.u32 %s502_s1, 4  ;;  %s4879_s4 = sshll.u32 %s7018_s25, 4  ;;  %s7015_s24 = int_to_ptr.vmem [resolvable:$true] %s4866_s24  ;;  %s7053_s4 = int_to_ptr.vmem [resolvable:$true] %s4879_s4 }
0x1843   : > { %s5948_s16 = scalar_lea.vmem %s7015_s24, 128  ;;  %p5955_p0 = scmp.lt.s32.totalorder %s7015_s24, %s5953_s26 }
0x1844   : > { %p5949_p11 = scmp.ne.s32.totalorder %s7015_s24, %s5948_s16  ;;  %p5956_p1 = scmp.lt.s32.totalorder %s5954_s0, %s5948_s16 }
0x1846   : > { %p5950_p12 = pnand %p5949_p11, %p6176_p5  ;;  %p5957_p2 = por %p5956_p1, %p5955_p0 }
0x1848   : > { %p5951_p13 = pneg %p5950_p12 }
0x184a   : > { %p5958_p3 = pnand %p5957_p2, %p5951_p13 }
0x18b2   : > { %v4753_v14 = vpop.xlane.xlu1 %4752 }
0x18b3   : > { %v4754_v15 = vmul.f32 0.03125, %v4753_v14 }
0x18b5   : > { %v4755_v16 = vadd.f32 1e-05, %v4754_v15 }
0x18b6   : > { %v4585_v20 = vpop.permute.xlu1 %4584 }
0x18b7   : > { %5944 = vrsqrt.f32 %v4755_v16  ;;  %v4836_v17 = vpop.xlane.xlu0 %4835 }
0x18b8   : > { %v4837_v18 = vmul.f32 0.03125, %v4836_v17 }
0x18ba   : > { %v4838_v19 = vadd.f32 1e-05, %v4837_v18 }
0x18bb   : > { %v4582_v55 = vpop.permute.xlu0 %4581 }
0x18bc   : > { %5946 = vrsqrt.f32 %v4838_v19  ;;  %v4588_v21 = vsel %vm737_vm2, %v4587_v34, %v4582_v55 }
0x18bd   : > { %v4590_v22 = vsel %vm4589_vm4, %v4588_v21, %v4585_v20 }
0x18be   : > { %4591 = vst.msk [vmem:[%s527_s30] sm:$0xff] %vm650_vm0, %v4590_v22 }
0x18c1   : > { %v5945_v23 = vpop.eup %5944 }
0x18c2   : > { %v4757_v24 = vmul.f32 %v5945_v23, %v4749_v1 }
0x18c4   : > { %4841 = vst.msk [vmem:[%s502_s1] sm:$0xff] %vm650_vm0, %v4757_v24 }
0x18c5   : > { %5961 = shalt.err (!%p5958_p3)
}
0x18c6   : > { %s5962_s30 = scalar_lea.hbm %s7013_s2, 128  ;;  %s5966_s29 = scalar_lea.hbm %s7109_s13, 256 }
0x18c7   : > { %p5963_p4 = scmp.ne.s32.totalorder %s7013_s2, %s5962_s30  ;;  %p5967_p9 = scmp.lt.u32.totalorder %s7013_s2, %s7109_s13 }
0x18c8   : > { %p5968_p10 = scmp.lt.u32.totalorder %s5966_s29, %s5962_s30  ;;  %p5970_p12 = scmp.lt.u32.totalorder %s5962_s30, %s7013_s2 }
0x18c9   : > { %p5964_p7 = pnand %p5963_p4, %p6176_p5 }
0x18ca   : > { %p5969_p11 = por %p5968_p10, %p5967_p9 }
0x18cb   : > { %p5965_p8 = pneg %p5964_p7 }
0x18cc   : > { %p5971_p13 = por %p5970_p12, %p5969_p11 }
0x18ce   : > { %p5972_p0 = pnand %p5971_p13, %p5965_p8 }
0x18d0   : > { %5975 = shalt.err (!%p5972_p0)
}
0x18d1   : > { %5828 = dma.vmem_to_hbm [thread:$0]  (%p6176_p5), %s7015_s24, 128, %s7013_s2, %s4844_s5   ;;  %v5947_v49 = vpop.eup %5946 }
0x18d2   : > { %v4840_v25 = vmul.f32 %v5947_v49, %v6987_v6  ;;  %s7049_s0 = scalar_lea.hbm %s7110_s14, %s5084_s23  ;;  %s4849_s30 = scalar_lea.sflag [#allocation5], %s6996_s27 }
0x18d3   : > { %s5976_s17 = scalar_lea.vmem %s7053_s4, 128  ;;  %s6057_s22 = smov [#allocation4]  }
0x18d4   : > { %4842 = vst.msk [vmem:[%s7018_s25] sm:$0xff] %vm650_vm0, %v4840_v25  ;;  %p5977_p1 = scmp.ne.s32.totalorder %s7053_s4, %s5976_s17  ;;  %s5980_s24 = sshll.u32 %s6057_s22, 4  ;;  %s5981_s24 = int_to_ptr.vmem [resolvable:$false] %s5980_s24 }
0x18d5   : > { %s5982_s2 = scalar_lea.vmem %s5981_s24, 256  ;;  %p5983_p4 = scmp.lt.s32.totalorder %s7053_s4, %s5981_s24 }
0x18d6   : > { %p5978_p2 = pnand %p5977_p1, %p6176_p5  ;;  %p5984_p7 = scmp.lt.s32.totalorder %s5982_s2, %s5976_s17 }
0x18d8   : > { %p5979_p3 = pneg %p5978_p2  ;;  %p5985_p8 = por %p5984_p7, %p5983_p4 }
0x18da   : > { %p5986_p9 = pnand %p5985_p8, %p5979_p3 }
0x18dc   : > { %5989 = shalt.err (!%p5986_p9)
}
0x18dd   : > { %s5990_s27 = scalar_lea.hbm %s7049_s0, 128  ;;  %s5994_s5 = scalar_lea.hbm %s7110_s14, 256 }
0x18de   : > { %p5991_p10 = scmp.ne.s32.totalorder %s7049_s0, %s5990_s27  ;;  %p5995_p13 = scmp.lt.u32.totalorder %s7049_s0, %s7110_s14 }
0x18df   : > { %p5996_p0 = scmp.lt.u32.totalorder %s5994_s5, %s5990_s27  ;;  %p5998_p2 = scmp.lt.u32.totalorder %s5990_s27, %s7049_s0 }
0x18e0   : > { %p5992_p11 = pnand %p5991_p10, %p6176_p5 }
0x18e1   : > { %p5997_p1 = por %p5996_p0, %p5995_p13 }
0x18e2   : > { %p5993_p12 = pneg %p5992_p11 }
0x18e3   : > { %p5999_p3 = por %p5998_p2, %p5997_p1 }
0x18e5   : > { %p6000_p4 = pnand %p5999_p3, %p5993_p12 }
0x18e7   : > { %6003 = shalt.err (!%p6000_p4)
}
0x18e8   : > { %5829 = dma.vmem_to_hbm [thread:$0]  (%p6176_p5), %s7053_s4, 128, %s7049_s0, %s4849_s30  }
0x18e9 PF: > { %p5839_p7 = scmp.ge.s32.totalorder %s6042_s21, 2  ;;  %s4894_s20 = sand.u32 1, %s6030_s18  }
0x18ea   : > { %s4895_s16 = scalar_lea.sflag [#allocation3], %s4894_s20 }
0x18eb   : > { %p5833_p8 = pnand %p5839_p7, %p6180_p6 }
0x18ed   : > { %6021 = dma.done.wait (!%p5833_p8), %s4895_s16, 128  }
0x18ee   : > { %6023 = vsyncadd (!%p5833_p8), %s4895_s16, 4294967168  ;;  %s4904_s26 = scalar_lea.sflag [#allocation5], %s4894_s20 }
0x18ef   : > { %6025 = dma.done.wait (!%p5833_p8), %s4904_s26, 128  }
0x18f0   : > { %6027 = vsyncadd (!%p5833_p8), %s4904_s26, 4294967168  ;;  %s7156_s21 = sld [smem:[#allocation9_spill]]  ;;  %s7157_s28 = sld [smem:[#allocation8_spill]] }
0x18f1   : > { %s7158_s20 = sld [smem:[#allocation10_spill]]  ;;  %s7159_s18 = smov %s6034_s19 }
0x18f6   : > { %p29_p5 = scmp.ge.s32.totalorder %s7156_s21, 4   ;;  %s7160_s19 = smov %s7157_s28 }
0x18f8   :  { %31 = sbr.rel (!%p29_p5) target bundleno = 12 (0xc), region = 139 }
0x18ff   :  { %4916 = vsyncpa [#allocation3], 1 }
0x1900   :  { %4918 = vsyncpa [#allocation3 + $0x1], 1 }
0x1901   :  { %4919 = vsyncpa [#allocation5], 1 }
0x1902   :  { %4921 = vsyncpa [#allocation5 + $0x1], 1 }

</bundles_post_ra>
